<compile_context>
chip_gen: v7x
topology: tpu7x:2x2x1
jax: 0.10.0
libtpu: 0.0.40
codegen_flags: <defaults>
</compile_context>

<pallas_src>
import math

import jax
import jax.numpy as jnp
from jax.experimental import pallas as pl
from jax.experimental.pallas import tpu as pltpu


def _round_up(n, m):
    return ((n + m - 1) // m) * m


# --------------------------------------------------------------------------
# Wrapper: layout plumbing (im2col, padding, weight packing) + fused kernel
# --------------------------------------------------------------------------
def cnn_forward(params, x):
    """Pallas equivalent of CNN.forward (1 conv layer, relu, bn=False)."""
    conv_w, conv_b, w1, b1, w2, b2 = params            # PyTorch-convention shapes
    B, C, H, W = x.shape
    Co = conv_w.shape[0]
    Ho, Wo = H - 2, W - 2                              # 3x3 valid conv
    Hp, Wp = Ho // 2, Wo // 2                          # maxpool 2x2 stride 2
    P = Hp * Wp                                        # pooled positions (49)
    Pp = _round_up(P, 8)                               # sublane-aligned positions (56)
    H1 = w1.shape[0]                                   # hidden (32)
    N = w2.shape[0]                                    # classes (10)
    KC = 9 * C                                         # im2col columns (36)
    Np = _round_up(N, 128)                             # lane-dense head width
    Bp = _round_up(B, 8)                               # sublane-aligned batch
    BB = min(Bp, 128)                                  # batch block per grid step
    Bp = _round_up(Bp, BB)

    # ---- bf16 everywhere in the prep path: halves the im2col HBM traffic ----
    xb = jnp.zeros((Bp, C, H, W), jnp.bfloat16).at[:B].set(x.astype(jnp.bfloat16))

    # Batch-major im2col, one strided slice per (pool-quadrant, conv-tap).
    taps = []
    for qi in range(2):
        for qj in range(2):
            for kh in range(3):
                for kw in range(3):
                    si, sj = qi + kh, qj + kw
                    taps.append(xb[:, :, si:si + 2 * Hp - 1:2, sj:sj + 2 * Wp - 1:2])
    t = jnp.stack(taps, axis=0).reshape(4, 9, Bp, C, Hp, Wp)   # (q, tap, b, c, ip, jp)
    t = jnp.transpose(t, (2, 0, 4, 5, 1, 3))                   # (b, q, ip, jp, tap, c)
    t = t.reshape(Bp, 4, P, KC)
    patches = jnp.zeros((Bp, 4, Pp, KC), jnp.bfloat16).at[:, :, :P, :].set(t)
    patches = patches.reshape(Bp, 4 * Pp, KC)        # rows (q, p) per batch, cols (tap, c)

    # Conv weight (Co,C,3,3) -> (9C, Co), rows ordered (kh, kw, c).
    wc = jnp.transpose(conv_w, (2, 3, 1, 0)).reshape(KC, Co)
    # Linear1 weight (H1, Co*P NCHW-flat) -> (P*Co, H1) rows ordered (p, c);
    # the Pp padding rows stay zero so padded pool positions contribute nothing.
    w1_pc = jnp.transpose(w1.reshape(H1, Co, P), (2, 1, 0)).reshape(P * Co, H1)

    # Pack all weights/biases into two lane-dense bf16 slabs (fewer DMAs).
    W1_OFF = _round_up(KC + 2, 16)
    Rn = W1_OFF + Pp * Co
    Wn = max(Co, H1)
    wn = jnp.zeros((Rn, Wn), jnp.bfloat16)
    wn = wn.at[0:KC, 0:Co].set(wc.astype(jnp.bfloat16))
    wn = wn.at[KC, 0:Co].set(conv_b.astype(jnp.bfloat16))
    wn = wn.at[KC + 1, 0:H1].set(b1.astype(jnp.bfloat16))
    wn = wn.at[W1_OFF:W1_OFF + P * Co, 0:H1].set(w1_pc.astype(jnp.bfloat16))

    Rh = _round_up(H1 + 1, 16)
    wh = jnp.zeros((Rh, Np), jnp.bfloat16)
    wh = wh.at[0:H1, 0:N].set(w2.T.astype(jnp.bfloat16))
    wh = wh.at[H1, 0:N].set(b2.astype(jnp.bfloat16))

    def kernel(p_ref, wn_ref, wh_ref, o_ref):
        # Carve the packed weight slabs with static views.
        wc_k = wn_ref[0:KC, 0:Co]                               # (36, 8)   bf16
        cb_k = wn_ref[KC:KC + 1, 0:Co].astype(jnp.float32)      # (1, 8)
        b1_k = wn_ref[KC + 1:KC + 2, 0:H1].astype(jnp.float32)  # (1, H1)
        w1_k = wn_ref[W1_OFF:W1_OFF + Pp * Co, 0:H1]            # (Pp*Co, H1) bf16
        w2_k = wh_ref[0:H1, :]                                  # (H1, Np)  bf16
        b2_k = wh_ref[H1:H1 + 1, :].astype(jnp.float32)         # (1, Np)

        # Conv: ONE matmul over all quadrants x pooled positions x batch rows.
        lhs = p_ref[...].reshape(BB * 4 * Pp, KC)
        z = jnp.dot(lhs, wc_k, preferred_element_type=jnp.float32)
        z = z.reshape(BB, 4, Pp, Co)
        # 2x2 max-pool == max over the 4 quadrant blocks (3 VPU maxes);
        # bias + ReLU applied once after the max (relu(max) == max(relu)).
        pooled = jnp.maximum(jnp.maximum(z[:, 0], z[:, 1]),
                             jnp.maximum(z[:, 2], z[:, 3]))     # (BB, Pp, Co)
        pooled = jnp.maximum(pooled + cb_k, 0.0)

        # NCHW flatten + Linear1 as ONE matmul; the flatten-order permutation
        # lives in w1_k's row ordering, so only one in-kernel relayout is needed.
        h = pooled.reshape(BB, Pp * Co).astype(jnp.bfloat16)    # (BB, Pp*Co)
        h1 = jnp.maximum(
            jnp.dot(h, w1_k, preferred_element_type=jnp.float32) + b1_k, 0.0)

        # Head, zero-padded to a lane-dense 128-wide slab (dense stores).
        out = jnp.dot(h1.astype(jnp.bfloat16), w2_k,
                      preferred_element_type=jnp.float32) + b2_k
        o_ref[...] = out.astype(o_ref.dtype)

    out = pl.pallas_call(
        kernel,
        out_shape=jax.ShapeDtypeStruct((Bp, Np), jnp.float32),
        grid=(Bp // BB,),
        in_specs=[
            pl.BlockSpec((BB, 4 * Pp, KC), lambda i: (i, 0, 0)),   # patches (batch-blocked)
            pl.BlockSpec((Rn, Wn), lambda i: (0, 0)),              # packed narrow weights
            pl.BlockSpec((Rh, Np), lambda i: (0, 0)),              # packed head weights
        ],
        out_specs=pl.BlockSpec((BB, Np), lambda i: (i, 0)),
        compiler_params=pltpu.CompilerParams(dimension_semantics=("parallel",)),
    )(patches, wn, wh)

    return out[:B, :N]


# --------------------------------------------------------------------------
# Pure-JAX reference (PyTorch-faithful, f32) and parameter init
# --------------------------------------------------------------------------
def cnn_reference(params, x):
    conv_w, conv_b, w1, b1, w2, b2 = params
    y = jax.lax.conv_general_dilated(
        x, conv_w, window_strides=(1, 1), padding='VALID',
        dimension_numbers=('NCHW', 'OIHW', 'NCHW'))
    y = jnp.maximum(y + conv_b.reshape(1, -1, 1, 1), 0.0)
    y = jax.lax.reduce_window(y, -jnp.inf, jax.lax.max,
                              window_dimensions=(1, 1, 2, 2),
                              window_strides=(1, 1, 2, 2), padding='VALID')
    flat = y.reshape(x.shape[0], -1)                    # NCHW flatten
    h1 = jnp.maximum(flat @ w1.T + b1, 0.0)
    return h1 @ w2.T + b2


def init_cnn_params(key, *, c_in, c_out, h_in, w_in, hidden, n_classes):
    """Deterministic init mimicking nn.Conv2d / nn.Linear (U(+-1/sqrt(fan_in)))."""
    hp, wp = (h_in - 2) // 2, (w_in - 2) // 2
    f = c_out * hp * wp
    k1, k2, k3, k4, k5, k6 = jax.random.split(key, 6)
    bc = 1.0 / math.sqrt(c_in * 9)
    conv_w = jax.random.uniform(k1, (c_out, c_in, 3, 3), jnp.float32, -bc, bc)
    conv_b = jax.random.uniform(k2, (c_out,), jnp.float32, -bc, bc)
    b1b = 1.0 / math.sqrt(f)
    w1 = jax.random.uniform(k3, (hidden, f), jnp.float32, -b1b, b1b)
    b1 = jax.random.uniform(k4, (hidden,), jnp.float32, -b1b, b1b)
    b2b = 1.0 / math.sqrt(hidden)
    w2 = jax.random.uniform(k5, (n_classes, hidden), jnp.float32, -b2b, b2b)
    b2 = jax.random.uniform(k6, (n_classes,), jnp.float32, -b2b, b2b)
    return (conv_w, conv_b, w1, b1, w2, b2)


# --------------------------------------------------------------------------
if __name__ == "__main__":
    key = jax.random.PRNGKey(0)
    kp, kx = jax.random.split(key)

    # dims = [1, (4, 3, 8), (392, 32), (32, 10)], h_in = w_in = 16, batch = 2
    params = init_cnn_params(kp, c_in=4, c_out=8, h_in=16, w_in=16,
                             hidden=32, n_classes=10)
    x = jax.random.normal(kx, (2, 4, 16, 16), dtype=jnp.float32)

    fwd = jax.jit(cnn_forward)
    out = jax.block_until_ready(fwd(params, x))

    ref = cnn_reference(params, x)
    assert out.shape == (2, 10), out.shape
    # bf16 MXU operands with f32 accumulation -> tolerance relaxed vs the f32
    # reference (deliberate precision/perf tradeoff from the review).
    assert jnp.allclose(out, ref, atol=3e-2, rtol=3e-2), \
        float(jnp.max(jnp.abs(out - ref)))

    print("KERNEL_OK")
</pallas_src>

<mosaic_0001>
module attributes {stable_mosaic.version = 11 : i64} {
  func.func @kernel(%arg0: i32, %arg1: memref<8x224x36xbf16, #tpu.memory_space<vmem>>, %arg2: memref<496x32xbf16, #tpu.memory_space<vmem>>, %arg3: memref<48x128xbf16, #tpu.memory_space<vmem>>, %arg4: memref<8x128xf32, #tpu.memory_space<vmem>>) attributes {dimension_semantics = [#tpu.dimension_semantics<parallel>], iteration_bounds = array<i64: 1>, scalar_prefetch = 0 : i64, scratch_operands = 0 : i64, tpu.core_type = #tpu.core_type<tc>, window_params = [{transform_indices = @transform_0, window_bounds = array<i64: 8, 224, 36>}, {pipeline_mode = #tpu.pipeline_mode<synchronous>, transform_indices = @transform_1, window_bounds = array<i64: 496, 32>}, {pipeline_mode = #tpu.pipeline_mode<synchronous>, transform_indices = @transform_2, window_bounds = array<i64: 48, 128>}, {transform_indices = @transform_3, window_bounds = array<i64: 8, 128>}]} {
    %c0 = arith.constant 0 : index
    %c0_0 = arith.constant 0 : index
    %0 = vector.load %arg2[%c0, %c0_0] : memref<496x32xbf16, #tpu.memory_space<vmem>>, vector<36x8xbf16>
    %c36 = arith.constant 36 : index
    %c0_1 = arith.constant 0 : index
    %1 = vector.load %arg2[%c36, %c0_1] : memref<496x32xbf16, #tpu.memory_space<vmem>>, vector<1x8xbf16>
    %2 = arith.extf %1 : vector<1x8xbf16> to vector<1x8xf32>
    %c37 = arith.constant 37 : index
    %c0_2 = arith.constant 0 : index
    %3 = vector.load %arg2[%c37, %c0_2] : memref<496x32xbf16, #tpu.memory_space<vmem>>, vector<1x32xbf16>
    %4 = arith.extf %3 : vector<1x32xbf16> to vector<1x32xf32>
    %c48 = arith.constant 48 : index
    %c0_3 = arith.constant 0 : index
    %5 = vector.load %arg2[%c48, %c0_3] : memref<496x32xbf16, #tpu.memory_space<vmem>>, vector<448x32xbf16>
    %c0_4 = arith.constant 0 : index
    %c0_5 = arith.constant 0 : index
    %6 = vector.load %arg3[%c0_4, %c0_5] : memref<48x128xbf16, #tpu.memory_space<vmem>>, vector<32x128xbf16>
    %c32 = arith.constant 32 : index
    %c0_6 = arith.constant 0 : index
    %7 = vector.load %arg3[%c32, %c0_6] : memref<48x128xbf16, #tpu.memory_space<vmem>>, vector<1x128xbf16>
    %8 = arith.extf %7 : vector<1x128xbf16> to vector<1x128xf32>
    %c0_7 = arith.constant 0 : index
    %c0_8 = arith.constant 0 : index
    %c0_9 = arith.constant 0 : index
    %9 = vector.load %arg1[%c0_7, %c0_8, %c0_9] : memref<8x224x36xbf16, #tpu.memory_space<vmem>>, vector<8x224x36xbf16>
    %10 = vector.shape_cast %9 : vector<8x224x36xbf16> to vector<1792x36xbf16>
    %cst = arith.constant dense<0.000000e+00> : vector<1792x8xf32>
    %11 = tpu.matmul %10, %0, %cst {dimension_numbers = #tpu.dot_dimension_numbers<[1], [0], [0], [1], [0, 0, 1, 1], [], []>} : vector<1792x36xbf16>, vector<36x8xbf16>, vector<1792x8xf32> -> vector<1792x8xf32>
    %12 = vector.shape_cast %11 : vector<1792x8xf32> to vector<8x4x56x8xf32>
    %13 = vector.extract_strided_slice %12 {offsets = [0, 0, 0, 0], sizes = [8, 1, 56, 8], strides = [1, 1, 1, 1]} : vector<8x4x56x8xf32> to vector<8x1x56x8xf32>
    %14 = vector.shape_cast %13 : vector<8x1x56x8xf32> to vector<8x56x8xf32>
    %15 = vector.extract_strided_slice %12 {offsets = [0, 1, 0, 0], sizes = [8, 1, 56, 8], strides = [1, 1, 1, 1]} : vector<8x4x56x8xf32> to vector<8x1x56x8xf32>
    %16 = vector.shape_cast %15 : vector<8x1x56x8xf32> to vector<8x56x8xf32>
    %17 = arith.maximumf %14, %16 : vector<8x56x8xf32>
    %18 = vector.extract_strided_slice %12 {offsets = [0, 2, 0, 0], sizes = [8, 1, 56, 8], strides = [1, 1, 1, 1]} : vector<8x4x56x8xf32> to vector<8x1x56x8xf32>
    %19 = vector.shape_cast %18 : vector<8x1x56x8xf32> to vector<8x56x8xf32>
    %20 = vector.extract_strided_slice %12 {offsets = [0, 3, 0, 0], sizes = [8, 1, 56, 8], strides = [1, 1, 1, 1]} : vector<8x4x56x8xf32> to vector<8x1x56x8xf32>
    %21 = vector.shape_cast %20 : vector<8x1x56x8xf32> to vector<8x56x8xf32>
    %22 = arith.maximumf %19, %21 : vector<8x56x8xf32>
    %23 = arith.maximumf %17, %22 : vector<8x56x8xf32>
    %24 = vector.shape_cast %2 : vector<1x8xf32> to vector<1x1x8xf32>
    %25 = vector.broadcast %24 : vector<1x1x8xf32> to vector<8x56x8xf32>
    %26 = arith.addf %23, %25 : vector<8x56x8xf32>
    %cst_10 = arith.constant 0.000000e+00 : f32
    %27 = vector.broadcast %cst_10 : f32 to vector<8x56x8xf32>
    %28 = arith.maximumf %26, %27 : vector<8x56x8xf32>
    %29 = vector.shape_cast %28 : vector<8x56x8xf32> to vector<8x448xf32>
    %30 = arith.truncf %29 : vector<8x448xf32> to vector<8x448xbf16>
    %cst_11 = arith.constant dense<0.000000e+00> : vector<8x32xf32>
    %31 = tpu.matmul %30, %5, %cst_11 {dimension_numbers = #tpu.dot_dimension_numbers<[1], [0], [0], [1], [0, 0, 1, 1], [], []>} : vector<8x448xbf16>, vector<448x32xbf16>, vector<8x32xf32> -> vector<8x32xf32>
    %32 = vector.broadcast %4 : vector<1x32xf32> to vector<8x32xf32>
    %33 = arith.addf %31, %32 : vector<8x32xf32>
    %cst_12 = arith.constant 0.000000e+00 : f32
    %34 = vector.broadcast %cst_12 : f32 to vector<8x32xf32>
    %35 = arith.maximumf %33, %34 : vector<8x32xf32>
    %36 = arith.truncf %35 : vector<8x32xf32> to vector<8x32xbf16>
    %cst_13 = arith.constant dense<0.000000e+00> : vector<8x128xf32>
    %37 = tpu.matmul %36, %6, %cst_13 {dimension_numbers = #tpu.dot_dimension_numbers<[1], [0], [0], [1], [0, 0, 1, 1], [], []>} : vector<8x32xbf16>, vector<32x128xbf16>, vector<8x128xf32> -> vector<8x128xf32>
    %38 = vector.broadcast %8 : vector<1x128xf32> to vector<8x128xf32>
    %39 = arith.addf %37, %38 : vector<8x128xf32>
    %c0_14 = arith.constant 0 : index
    %c0_15 = arith.constant 0 : index
    %40 = vector.load %arg4[%c0_14, %c0_15] : memref<8x128xf32, #tpu.memory_space<vmem>>, vector<8x128xf32>
    tpu.vector_store %arg4[%c0_14, %c0_15], %39 {strides = array<i32>} : memref<8x128xf32, #tpu.memory_space<vmem>>, vector<8x128xf32>,
    return
  }
  func.func @transform_0(%arg0: i32) -> (i32, i32, i32) {
    %c0_i32 = arith.constant 0 : i32
    %c0_i32_0 = arith.constant 0 : i32
    %c0_i32_1 = arith.constant 0 : i32
    return %arg0, %c0_i32, %c0_i32_0 : i32, i32, i32
  }
  func.func @transform_1(%arg0: i32) -> (i32, i32) {
    %c0_i32 = arith.constant 0 : i32
    %c0_i32_0 = arith.constant 0 : i32
    %c0_i32_1 = arith.constant 0 : i32
    return %c0_i32, %c0_i32_0 : i32, i32
  }
  func.func @transform_2(%arg0: i32) -> (i32, i32) {
    %c0_i32 = arith.constant 0 : i32
    %c0_i32_0 = arith.constant 0 : i32
    %c0_i32_1 = arith.constant 0 : i32
    return %c0_i32, %c0_i32_0 : i32, i32
  }
  func.func @transform_3(%arg0: i32) -> (i32, i32) {
    %c0_i32 = arith.constant 0 : i32
    %c0_i32_0 = arith.constant 0 : i32
    return %arg0, %c0_i32 : i32, i32
  }
}

</mosaic_0001>

<bundles_post_ra>
// kernel: cnn_forward.1
= control target key start
LH: loop header
LB: loop body
LE: loop exit
PB: predicated region body
PF: predicated region fallthrough
CT: control target
= control target key end

     0   :  { %vm883_vm0 = vcmask 293888   ;;  %vm1220_vm1 = vcmask 1041408   ;;  %s4901_s4 = smov 24   ;;  %s4902_s5 = smov 8   ;;  %vm3597_vm2 = vcmask 64512   ;;  %vm3599_vm3 = vcmask 130048   ;;  %s6837_s1 = inlined_call_operand.vmem [shape: bf16[496,32], index: 1, kind: input, shape index: {}]   ;;  %s6838_s0 = inlined_call_operand.vmem [shape: bf16[8,224,36], index: 0, kind: input, shape index: {}]   ;;  %s6839_s2 = inlined_call_operand.vmem [shape: bf16[48,128], index: 2, kind: input, shape index: {}]   ;;  %s6840_s3 = inlined_call_operand.vmem [shape: f32[8,128], index: 3, kind: output, shape index: {}]  }
   0x1   :  { %v4754_v0 = vld [vmem:[%s6837_s1] sm:$0xff]   ;;  %v4755_v1 = vld [vmem:[%s6837_s1 + $0x8] sm:$0xff]   ;;  %v4756_v2 = vld [vmem:[%s6837_s1 + $0x10] ss:$0 sps:$4 sm:$0x33]   ;;  %s4903_s6 = smov 32  }
   0x2   :  { %4388 = vmatprep.subr.bf16.mxu0 %v4754_v0  ;;  %4626 = vmatprep.subr.bf16.mxu1 %v4754_v0  ;;  %v4757_v3 = vld [vmem:[%s6838_s0] sm:$0xff]   ;;  %v1222_v5 = vsel %vm1220_vm1, %v4756_v2, 0  ;;  %v4759_v6 = vld [vmem:[%s6838_s0 + $0x8] sm:$0xff]   ;;  %v4761_v8 = vld [vmem:[%s6838_s0 + $0x10] sm:$0xff]   ;;  %s4904_s7 = smov 16   ;;  %s4905_s8 = smov 48  }
   0x3   :  { %4389 = vmatpush3.bf16.msra.mxu0 %v4754_v0  ;;  %4629 = vmatpush3.bf16.msra.mxu1 %v4754_v0  ;;  %v4758_v4 = vld [vmem:[%s6838_s0 + $0x200] sm:$0xff]   ;;  %v4760_v7 = vld [vmem:[%s6838_s0 + $0x208] sm:$0xff]   ;;  %v4762_v9 = vld [vmem:[%s6838_s0 + $0x210] sm:$0xff]   ;;  %s4906_s9 = smov 40   ;;  %s4907_s10 = smov 56   ;;  %vm3601_vm4 = vcmask 195584  }
   0x4   :  { %4390 = vmatprep.subr.bf16.mxu0 %v4755_v1  ;;  %4627 = vmatprep.subr.bf16.mxu1 %v4755_v1  ;;  %v4763_v10 = vld [vmem:[%s6838_s0 + $0x18] sm:$0xff]   ;;  %v4765_v12 = vld [vmem:[%s6838_s0 + $0x20] sm:$0xff]   ;;  %v4767_v14 = vld [vmem:[%s6838_s0 + $0x28] sm:$0xff]   ;;  %s4908_s11 = smov 64   ;;  %s4909_s12 = smov 72   ;;  %vm3603_vm5 = vcmask 261120  }
   0x5   :  { %4394 = vmatprep.mubr.msk.bf16.mxu0 %vm883_vm0, %v4757_v3  ;;  %4522 = vmatprep.mubr.msk.bf16.mxu1 %vm883_vm0, %v4758_v4  ;;  %v4764_v11 = vld [vmem:[%s6838_s0 + $0x218] sm:$0xff]   ;;  %v4766_v13 = vld [vmem:[%s6838_s0 + $0x220] sm:$0xff]   ;;  %v4768_v15 = vld [vmem:[%s6838_s0 + $0x228] sm:$0xff]   ;;  %s4910_s13 = smov 80   ;;  %s4911_s14 = smov 88   ;;  %vm3605_vm6 = vcmask 326656  }
   0x6   :  { %v4769_v16 = vld [vmem:[%s6838_s0 + $0x30] sm:$0xff]   ;;  %v4771_v18 = vld [vmem:[%s6838_s0 + $0x38] sm:$0xff]   ;;  %v4773_v20 = vld [vmem:[%s6838_s0 + $0x40] sm:$0xff]   ;;  %s4912_s15 = smov 96   ;;  %s4913_s16 = smov 104   ;;  %vm3607_vm7 = vcmask 392192  }
   0x7   :  { %4391 = vmatpush3.bf16.msra.mxu0 %v4755_v1  ;;  %4630 = vmatpush3.bf16.msra.mxu1 %v4755_v1  ;;  %v4770_v17 = vld [vmem:[%s6838_s0 + $0x230] sm:$0xff]   ;;  %v4772_v19 = vld [vmem:[%s6838_s0 + $0x238] sm:$0xff]   ;;  %v4774_v21 = vld [vmem:[%s6838_s0 + $0x240] sm:$0xff]   ;;  %s4914_s17 = smov 112   ;;  %s4915_s18 = smov 120   ;;  %vm3609_vm8 = vcmask 457728  }
   0x8   :  { %4632 = vmatprep.subr.msk.bf16.mxu0 %vm1220_vm1, %v4756_v2  ;;  %4633 = vmatprep.subr.msk.bf16.mxu1 %vm1220_vm1, %v4756_v2  ;;  %v4775_v22 = vld [vmem:[%s6838_s0 + $0x48] sm:$0xff]   ;;  %v4777_v24 = vld [vmem:[%s6838_s0 + $0x50] sm:$0xff]   ;;  %v4779_v26 = vld [vmem:[%s6838_s0 + $0x58] sm:$0xff]   ;;  %vm3611_vm9 = vcmask 523264   ;;  %vm3613_vm10 = vcmask 588800   ;;  %vm3615_vm11 = vcmask 654336  }
   0x9   :  { %v4776_v23 = vld [vmem:[%s6838_s0 + $0x248] sm:$0xff]   ;;  %v4778_v25 = vld [vmem:[%s6838_s0 + $0x250] sm:$0xff]   ;;  %v4780_v27 = vld [vmem:[%s6838_s0 + $0x258] sm:$0xff]   ;;  %vm3617_vm12 = vcmask 719872   ;;  %vm3619_vm13 = vcmask 785408   ;;  %vm3621_vm14 = vcmask 850944  }
   0xa   :  { %v4781_v28 = vld [vmem:[%s6838_s0 + $0x60] sm:$0xff]   ;;  %v4783_v30 = vld [vmem:[%s6838_s0 + $0x68] sm:$0xff]   ;;  %v4785_v32 = vld [vmem:[%s6838_s0 + $0x70] sm:$0xff]   ;;  %vm3623_vm15 = vcmask 916480   ;;  %vm4918_vm1 = vmmov 0  }
   0xb   :  { %4393 = vmatpush3.bf16.msra.mxu0 %v1222_v5  ;;  %4631 = vmatpush3.bf16.msra.mxu1 %v1222_v5  ;;  %v4782_v29 = vld [vmem:[%s6838_s0 + $0x260] sm:$0xff]   ;;  %v4784_v31 = vld [vmem:[%s6838_s0 + $0x268] sm:$0xff]   ;;  %v4786_v33 = vld [vmem:[%s6838_s0 + $0x270] sm:$0xff]  }
   0xc   :  { %v4787_v34 = vld [vmem:[%s6838_s0 + $0x78] sm:$0xff]   ;;  %v4789_v36 = vld [vmem:[%s6838_s0 + $0x80] sm:$0xff]   ;;  %v4791_v38 = vld [vmem:[%s6838_s0 + $0x88] sm:$0xff]  }
   0xd   :  { %v4788_v35 = vld [vmem:[%s6838_s0 + $0x278] sm:$0xff]   ;;  %v4790_v37 = vld [vmem:[%s6838_s0 + $0x280] sm:$0xff]   ;;  %v4792_v39 = vld [vmem:[%s6838_s0 + $0x288] sm:$0xff]  }
   0xe   :  { %4395 = vmatmul.mubr.msk.bf16.vlgmr.msra.gmra.mrb[0].mxu0 %vm883_vm0, %v4759_v6  ;;  %4523 = vmatmul.mubr.msk.bf16.vlgmr.msra.gmra.mrb[0].mxu1 %vm883_vm0, %v4760_v7  ;;  %v4793_v40 = vld [vmem:[%s6838_s0 + $0x90] sm:$0xff]   ;;  %v4795_v42 = vld [vmem:[%s6838_s0 + $0x98] sm:$0xff]   ;;  %v4797_v44 = vld [vmem:[%s6838_s0 + $0xa0] sm:$0xff]  }
   0xf   :  { %4398 = vmatprep.mubr.msk.bf16.mxu0 %vm883_vm0, %v4761_v8  ;;  %4526 = vmatprep.mubr.msk.bf16.mxu1 %vm883_vm0, %v4762_v9  ;;  %v4794_v41 = vld [vmem:[%s6838_s0 + $0x290] sm:$0xff]   ;;  %v4796_v43 = vld [vmem:[%s6838_s0 + $0x298] sm:$0xff]   ;;  %v4798_v45 = vld [vmem:[%s6838_s0 + $0x2a0] sm:$0xff]  }
  0x10   :  { %v4799_v46 = vld [vmem:[%s6838_s0 + $0xa8] sm:$0xff]   ;;  %v4801_v48 = vld [vmem:[%s6838_s0 + $0xb0] sm:$0xff]   ;;  %v4803_v50 = vld [vmem:[%s6838_s0 + $0xb8] sm:$0xff]  }
  0x11   :  { %v4800_v47 = vld [vmem:[%s6838_s0 + $0x2a8] sm:$0xff]   ;;  %v4802_v49 = vld [vmem:[%s6838_s0 + $0x2b0] sm:$0xff]   ;;  %v4804_v51 = vld [vmem:[%s6838_s0 + $0x2b8] sm:$0xff]  }
  0x12   :  { %v4805_v52 = vld [vmem:[%s6838_s0 + $0xc0] sm:$0xff]   ;;  %v4807_v54 = vld [vmem:[%s6838_s0 + $0xc8] sm:$0xff]   ;;  %v4809_v56 = vld [vmem:[%s6838_s0 + $0xd0] sm:$0xff]  }
  0x13   :  { %v4806_v53 = vld [vmem:[%s6838_s0 + $0x2c0] sm:$0xff]   ;;  %v4808_v55 = vld [vmem:[%s6838_s0 + $0x2c8] sm:$0xff]   ;;  %v4810_v57 = vld [vmem:[%s6838_s0 + $0x2d0] sm:$0xff]  }
  0x14   :  { %v4811_v58 = vld [vmem:[%s6838_s0 + $0xd8] sm:$0xff]   ;;  %v4813_v60 = vld [vmem:[%s6838_s0 + $0xe0] sm:$0xff]   ;;  %v4815_v62 = vld [vmem:[%s6838_s0 + $0xe8] sm:$0xff]  }
  0x15   :  { %v4812_v59 = vld [vmem:[%s6838_s0 + $0x2d8] sm:$0xff]   ;;  %v4814_v61 = vld [vmem:[%s6838_s0 + $0x2e0] sm:$0xff]   ;;  %v4816_v63 = vld [vmem:[%s6838_s0 + $0x2e8] sm:$0xff]  }
  0x16   :  { %4399 = vmatmul.mubr.msk.bf16.gmra.mrb[4].mxu0 %vm883_vm0, %v4763_v10  ;;  %4527 = vmatmul.mubr.msk.bf16.gmra.mrb[4].mxu1 %vm883_vm0, %v4764_v11  ;;  %v4817_v0 = vld [vmem:[%s6838_s0 + $0xf0] sm:$0xff]   ;;  %v4819_v2 = vld [vmem:[%s6838_s0 + $0xf8] sm:$0xff]   ;;  %v4821_v4 = vld [vmem:[%s6838_s0 + $0x100] sm:$0xff]  }
  0x17   :  { %4402 = vmatprep.mubr.msk.bf16.mxu0 %vm883_vm0, %v4765_v12  ;;  %4530 = vmatprep.mubr.msk.bf16.mxu1 %vm883_vm0, %v4766_v13  ;;  %v4818_v1 = vld [vmem:[%s6838_s0 + $0x2f0] sm:$0xff]   ;;  %v4820_v3 = vld [vmem:[%s6838_s0 + $0x2f8] sm:$0xff]   ;;  %v4822_v5 = vld [vmem:[%s6838_s0 + $0x300] sm:$0xff]  }
  0x18   :  { %v4823_v6 = vld [vmem:[%s6838_s0 + $0x108] sm:$0xff]   ;;  %v4825_v8 = vld [vmem:[%s6838_s0 + $0x110] sm:$0xff]   ;;  %v4827_v10 = vld [vmem:[%s6838_s0 + $0x118] sm:$0xff]  }
  0x19   :  { %v4824_v7 = vld [vmem:[%s6838_s0 + $0x308] sm:$0xff]   ;;  %v4826_v9 = vld [vmem:[%s6838_s0 + $0x310] sm:$0xff]   ;;  %v4828_v11 = vld [vmem:[%s6838_s0 + $0x318] sm:$0xff]  }
  0x1a   :  { %v4829_v12 = vld [vmem:[%s6838_s0 + $0x120] sm:$0xff]  }
  0x1b   :  { %v4830_v13 = vld [vmem:[%s6838_s0 + $0x320] sm:$0xff]  }
  0x1e   :  { %4403 = vmatmul.mubr.msk.bf16.gmra.mrb[8].mxu0 %vm883_vm0, %v4767_v14  ;;  %4531 = vmatmul.mubr.msk.bf16.gmra.mrb[8].mxu1 %vm883_vm0, %v4768_v15  ;;  %v4831_v14 = vld [vmem:[%s6838_s0 + $0x128] sm:$0xff]  }
  0x1f   :  { %4406 = vmatprep.mubr.msk.bf16.mxu0 %vm883_vm0, %v4769_v16  ;;  %4534 = vmatprep.mubr.msk.bf16.mxu1 %vm883_vm0, %v4770_v17  ;;  %v4832_v15 = vld [vmem:[%s6838_s0 + $0x328] sm:$0xff]   ;;  %v4833_v16 = vld [vmem:[%s6838_s0 + $0x130] sm:$0xff]  }
  0x20   :  { %v4834_v17 = vld [vmem:[%s6838_s0 + $0x330] sm:$0xff]  }
  0x26   :  { %4407 = vmatmul.mubr.msk.bf16.gmra.mrb[12].mxu0 %vm883_vm0, %v4771_v18  ;;  %4535 = vmatmul.mubr.msk.bf16.gmra.mrb[12].mxu1 %vm883_vm0, %v4772_v19  ;;  %v4835_v18 = vld [vmem:[%s6838_s0 + $0x138] sm:$0xff]  }
  0x27   :  { %4410 = vmatprep.mubr.msk.bf16.mxu0 %vm883_vm0, %v4773_v20  ;;  %4538 = vmatprep.mubr.msk.bf16.mxu1 %vm883_vm0, %v4774_v21  ;;  %v4836_v19 = vld [vmem:[%s6838_s0 + $0x338] sm:$0xff]   ;;  %v4837_v20 = vld [vmem:[%s6838_s0 + $0x140] sm:$0xff]  }
  0x28   :  { %v4838_v21 = vld [vmem:[%s6838_s0 + $0x340] sm:$0xff]  }
  0x2e   :  { %4411 = vmatmul.mubr.msk.bf16.gmra.mrb[16].mxu0 %vm883_vm0, %v4775_v22  ;;  %4539 = vmatmul.mubr.msk.bf16.gmra.mrb[16].mxu1 %vm883_vm0, %v4776_v23  ;;  %v4839_v22 = vld [vmem:[%s6838_s0 + $0x148] sm:$0xff]  }
  0x2f   :  { %4414 = vmatprep.mubr.msk.bf16.mxu0 %vm883_vm0, %v4777_v24  ;;  %4542 = vmatprep.mubr.msk.bf16.mxu1 %vm883_vm0, %v4778_v25  ;;  %v4840_v23 = vld [vmem:[%s6838_s0 + $0x348] sm:$0xff]   ;;  %v4841_v24 = vld [vmem:[%s6838_s0 + $0x150] sm:$0xff]  }
  0x30   :  { %v4842_v25 = vld [vmem:[%s6838_s0 + $0x350] sm:$0xff]  }
  0x36   :  { %4415 = vmatmul.mubr.msk.bf16.gmra.mrb[20].mxu0 %vm883_vm0, %v4779_v26  ;;  %4543 = vmatmul.mubr.msk.bf16.gmra.mrb[20].mxu1 %vm883_vm0, %v4780_v27  ;;  %v4843_v26 = vld [vmem:[%s6838_s0 + $0x158] sm:$0xff]  }
  0x37   :  { %4418 = vmatprep.mubr.msk.bf16.mxu0 %vm883_vm0, %v4781_v28  ;;  %4546 = vmatprep.mubr.msk.bf16.mxu1 %vm883_vm0, %v4782_v29  ;;  %v4844_v27 = vld [vmem:[%s6838_s0 + $0x358] sm:$0xff]   ;;  %v4845_v28 = vld [vmem:[%s6838_s0 + $0x160] sm:$0xff]  }
  0x38   :  { %v4846_v29 = vld [vmem:[%s6838_s0 + $0x360] sm:$0xff]  }
  0x3e   :  { %4419 = vmatmul.mubr.msk.bf16.gmra.mrb[24].mxu0 %vm883_vm0, %v4783_v30  ;;  %4547 = vmatmul.mubr.msk.bf16.gmra.mrb[24].mxu1 %vm883_vm0, %v4784_v31  ;;  %v4847_v30 = vld [vmem:[%s6838_s0 + $0x168] sm:$0xff]  }
  0x3f   :  { %4422 = vmatprep.mubr.msk.bf16.mxu0 %vm883_vm0, %v4785_v32  ;;  %4550 = vmatprep.mubr.msk.bf16.mxu1 %vm883_vm0, %v4786_v33  ;;  %v4848_v31 = vld [vmem:[%s6838_s0 + $0x368] sm:$0xff]   ;;  %v4849_v32 = vld [vmem:[%s6838_s0 + $0x170] sm:$0xff]  }
  0x40   :  { %v4850_v33 = vld [vmem:[%s6838_s0 + $0x370] sm:$0xff]  }
  0x46   :  { %4423 = vmatmul.mubr.msk.bf16.gmra.mrb[28].mxu0 %vm883_vm0, %v4787_v34  ;;  %4551 = vmatmul.mubr.msk.bf16.gmra.mrb[28].mxu1 %vm883_vm0, %v4788_v35  ;;  %v4851_v34 = vld [vmem:[%s6838_s0 + $0x178] sm:$0xff]  }
  0x47   :  { %4426 = vmatprep.mubr.msk.bf16.mxu0 %vm883_vm0, %v4789_v36  ;;  %4554 = vmatprep.mubr.msk.bf16.mxu1 %vm883_vm0, %v4790_v37  ;;  %v4852_v35 = vld [vmem:[%s6838_s0 + $0x378] sm:$0xff]   ;;  %v4853_v36 = vld [vmem:[%s6838_s0 + $0x180] sm:$0xff]   ;;  %v4854_v37 = vld [vmem:[%s6838_s0 + $0x188] sm:$0xff]  }
  0x4e   :  { %4427 = vmatmul.mubr.msk.bf16.gmra.mrb[32].mxu0 %vm883_vm0, %v4791_v38  ;;  %4555 = vmatmul.mubr.msk.bf16.gmra.mrb[32].mxu1 %vm883_vm0, %v4792_v39  ;;  %v4855_v38 = vld [vmem:[%s6838_s0 + $0x190] sm:$0xff]   ;;  %v4856_v39 = vld [vmem:[%s6838_s0 + $0x198] sm:$0xff]  }
  0x4f   :  { %4430 = vmatprep.mubr.msk.bf16.mxu0 %vm883_vm0, %v4793_v40  ;;  %4558 = vmatprep.mubr.msk.bf16.mxu1 %vm883_vm0, %v4794_v41  ;;  %v4857_v40 = vld [vmem:[%s6838_s0 + $0x1a0] sm:$0xff]   ;;  %v4858_v41 = vld [vmem:[%s6838_s0 + $0x1a8] sm:$0xff]  }
  0x56   :  { %4431 = vmatmul.mubr.msk.bf16.gmra.mrb[36].mxu0 %vm883_vm0, %v4795_v42  ;;  %4559 = vmatmul.mubr.msk.bf16.gmra.mrb[36].mxu1 %vm883_vm0, %v4796_v43  ;;  %v4859_v42 = vld [vmem:[%s6838_s0 + $0x1b0] sm:$0xff]  }
  0x57   :  { %4434 = vmatprep.mubr.msk.bf16.mxu0 %vm883_vm0, %v4797_v44  ;;  %4562 = vmatprep.mubr.msk.bf16.mxu1 %vm883_vm0, %v4798_v45 }
  0x5e   :  { %4435 = vmatmul.mubr.msk.bf16.gmra.mrb[40].mxu0 %vm883_vm0, %v4799_v46  ;;  %4563 = vmatmul.mubr.msk.bf16.gmra.mrb[40].mxu1 %vm883_vm0, %v4800_v47  ;;  %v4860_v46 = vld [vmem:[%s6838_s0 + $0x1b8] sm:$0xff]  }
  0x5f   :  { %4438 = vmatprep.mubr.msk.bf16.mxu0 %vm883_vm0, %v4801_v48  ;;  %4566 = vmatprep.mubr.msk.bf16.mxu1 %vm883_vm0, %v4802_v49  ;;  %v4861_v49 = vld [vmem:[%s6838_s0 + $0x1c0] sm:$0xff]  }
  0x66   :  { %4439 = vmatmul.mubr.msk.bf16.gmra.mrb[44].mxu0 %vm883_vm0, %v4803_v50  ;;  %4567 = vmatmul.mubr.msk.bf16.gmra.mrb[44].mxu1 %vm883_vm0, %v4804_v51 }
  0x67   :  { %4442 = vmatprep.mubr.msk.bf16.mxu0 %vm883_vm0, %v4805_v52  ;;  %4570 = vmatprep.mubr.msk.bf16.mxu1 %vm883_vm0, %v4806_v53 }
  0x6e   :  { %4443 = vmatmul.mubr.msk.bf16.gmra.mrb[48].mxu0 %vm883_vm0, %v4807_v54  ;;  %4571 = vmatmul.mubr.msk.bf16.gmra.mrb[48].mxu1 %vm883_vm0, %v4808_v55 }
  0x6f   :  { %4446 = vmatprep.mubr.msk.bf16.mxu0 %vm883_vm0, %v4809_v56  ;;  %4574 = vmatprep.mubr.msk.bf16.mxu1 %vm883_vm0, %v4810_v57  ;;  %v4862_v56 = vld [vmem:[%s6838_s0 + $0x1c8] sm:$0xff]  }
  0x76   :  { %4447 = vmatmul.mubr.msk.bf16.gmra.mrb[52].mxu0 %vm883_vm0, %v4811_v58  ;;  %4575 = vmatmul.mubr.msk.bf16.gmra.mrb[52].mxu1 %vm883_vm0, %v4812_v59  ;;  %v4863_v59 = vld [vmem:[%s6838_s0 + $0x1d0] sm:$0xff]  }
  0x77   :  { %4450 = vmatprep.mubr.msk.bf16.mxu0 %vm883_vm0, %v4813_v60  ;;  %4578 = vmatprep.mubr.msk.bf16.mxu1 %vm883_vm0, %v4814_v61 }
  0x7e   :  { %4451 = vmatmul.mubr.msk.bf16.gmra.mrb[56].mxu0 %vm883_vm0, %v4815_v62  ;;  %4579 = vmatmul.mubr.msk.bf16.gmra.mrb[56].mxu1 %vm883_vm0, %v4816_v63 }
  0x7f   :  { %4454 = vmatprep.mubr.msk.bf16.mxu0 %vm883_vm0, %v4817_v0  ;;  %4582 = vmatprep.mubr.msk.bf16.mxu1 %vm883_vm0, %v4818_v1 }
  0x86   :  { %4455 = vmatmul.mubr.msk.bf16.gmra.mrb[60].mxu0 %vm883_vm0, %v4819_v2  ;;  %4583 = vmatmul.mubr.msk.bf16.gmra.mrb[60].mxu1 %vm883_vm0, %v4820_v3 }
  0x87   :  { %4458 = vmatprep.mubr.msk.bf16.mxu0 %vm883_vm0, %v4821_v4  ;;  %4586 = vmatprep.mubr.msk.bf16.mxu1 %vm883_vm0, %v4822_v5  ;;  %v4864_v5 = vld [vmem:[%s6838_s0 + $0x1d8] sm:$0xff]  }
  0x8e   :  { %4459 = vmatmul.mubr.msk.bf16.gmra.mrb[64].mxu0 %vm883_vm0, %v4823_v6  ;;  %4587 = vmatmul.mubr.msk.bf16.gmra.mrb[64].mxu1 %vm883_vm0, %v4824_v7 }
  0x8f   :  { %4462 = vmatprep.mubr.msk.bf16.mxu0 %vm883_vm0, %v4825_v8  ;;  %4590 = vmatprep.mubr.msk.bf16.mxu1 %vm883_vm0, %v4826_v9 }
  0x96   :  { %4463 = vmatmul.mubr.msk.bf16.gmra.mrb[68].mxu0 %vm883_vm0, %v4827_v10  ;;  %4591 = vmatmul.mubr.msk.bf16.gmra.mrb[68].mxu1 %vm883_vm0, %v4828_v11  ;;  %v4865_v10 = vld [vmem:[%s6838_s0 + $0x1e0] sm:$0xff]  }
  0x97   :  { %4466 = vmatprep.mubr.msk.bf16.mxu0 %vm883_vm0, %v4829_v12  ;;  %4594 = vmatprep.mubr.msk.bf16.mxu1 %vm883_vm0, %v4830_v13 }
  0x9e   :  { %4467 = vmatmul.mubr.msk.bf16.gmra.mrb[72].mxu0 %vm883_vm0, %v4831_v14  ;;  %4595 = vmatmul.mubr.msk.bf16.gmra.mrb[72].mxu1 %vm883_vm0, %v4832_v15 }
  0x9f   :  { %4470 = vmatprep.mubr.msk.bf16.mxu0 %vm883_vm0, %v4833_v16  ;;  %4598 = vmatprep.mubr.msk.bf16.mxu1 %vm883_vm0, %v4834_v17 }
  0xa6   :  { %4471 = vmatmul.mubr.msk.bf16.gmra.mrb[76].mxu0 %vm883_vm0, %v4835_v18  ;;  %4599 = vmatmul.mubr.msk.bf16.gmra.mrb[76].mxu1 %vm883_vm0, %v4836_v19 }
  0xa7   :  { %4474 = vmatprep.mubr.msk.bf16.mxu0 %vm883_vm0, %v4837_v20  ;;  %4602 = vmatprep.mubr.msk.bf16.mxu1 %vm883_vm0, %v4838_v21 }
  0xae   :  { %4475 = vmatmul.mubr.msk.bf16.gmra.mrb[80].mxu0 %vm883_vm0, %v4839_v22  ;;  %4603 = vmatmul.mubr.msk.bf16.gmra.mrb[80].mxu1 %vm883_vm0, %v4840_v23  ;;  %v4866_v22 = vld [vmem:[%s6838_s0 + $0x1e8] sm:$0xff]  }
  0xaf   :  { %4478 = vmatprep.mubr.msk.bf16.mxu0 %vm883_vm0, %v4841_v24  ;;  %4606 = vmatprep.mubr.msk.bf16.mxu1 %vm883_vm0, %v4842_v25 }
  0xb6   :  { %4479 = vmatmul.mubr.msk.bf16.gmra.mrb[84].mxu0 %vm883_vm0, %v4843_v26  ;;  %4607 = vmatmul.mubr.msk.bf16.gmra.mrb[84].mxu1 %vm883_vm0, %v4844_v27  ;;  %v4867_v26 = vld [vmem:[%s6838_s0 + $0x1f0] sm:$0xff]  }
  0xb7   :  { %4482 = vmatprep.mubr.msk.bf16.mxu0 %vm883_vm0, %v4845_v28  ;;  %4610 = vmatprep.mubr.msk.bf16.mxu1 %vm883_vm0, %v4846_v29 }
  0xbe   :  { %4483 = vmatmul.mubr.msk.bf16.gmra.mrb[88].mxu0 %vm883_vm0, %v4847_v30  ;;  %4611 = vmatmul.mubr.msk.bf16.gmra.mrb[88].mxu1 %vm883_vm0, %v4848_v31 }
  0xbf   :  { %4486 = vmatprep.mubr.msk.bf16.mxu0 %vm883_vm0, %v4849_v32  ;;  %4614 = vmatprep.mubr.msk.bf16.mxu1 %vm883_vm0, %v4850_v33 }
  0xc6   :  { %4487 = vmatmul.mubr.msk.bf16.gmra.mrb[92].mxu0 %vm883_vm0, %v4851_v34  ;;  %4615 = vmatmul.mubr.msk.bf16.gmra.mrb[92].mxu1 %vm883_vm0, %v4852_v35  ;;  %v4868_v34 = vld [vmem:[%s6838_s0 + $0x1f8] sm:$0xff]  }
  0xc7   :  { %4490 = vmatprep.mubr.msk.bf16.mxu0 %vm883_vm0, %v4853_v36 }
  0xce   :  { %4491 = vmatmul.mubr.msk.bf16.gmra.mrb[96].mxu0 %vm883_vm0, %v4854_v37 }
  0xcf   :  { %4494 = vmatprep.mubr.msk.bf16.mxu0 %vm883_vm0, %v4855_v38 }
  0xd6   :  { %4495 = vmatmul.mubr.msk.bf16.gmra.mrb[100].mxu0 %vm883_vm0, %v4856_v39 }
  0xd7   :  { %4498 = vmatprep.mubr.msk.bf16.mxu0 %vm883_vm0, %v4857_v40 }
  0xde   :  { %4499 = vmatmul.mubr.msk.bf16.gmra.mrb[104].mxu0 %vm883_vm0, %v4858_v41 }
  0xdf   :  { %4502 = vmatprep.mubr.msk.bf16.mxu0 %vm883_vm0, %v4859_v42 }
  0xe1   :  { %v5360_v43 = vpop.f32.mrb[0].mxu0  ;;  %v5362_v44 = vpop.f32.mrb[0].mxu1 }
  0xe2   :  { %6871 = vst [vmem:[#allocation2_spill] sm:$0xff] %v5362_v44  ;;  %v5364_v45 = vpop.f32.mrb[1].mxu0  ;;  %v5369_v47 = vpop.f32.mrb[1].mxu1 }
  0xe3   :  { %6872 = vst [vmem:[#allocation3_spill] sm:$0xff] %v5369_v47  ;;  %v5371_v48 = vpop.f32.mrb[2].mxu0  ;;  %v5376_v50 = vpop.f32.mrb[2].mxu1 }
  0xe4   :  { %6873 = vst [vmem:[#allocation4_spill] sm:$0xff] %v5376_v50  ;;  %v5378_v51 = vpop.f32.mrb[3].mxu0  ;;  %v5380_v52 = vpop.f32.mrb[3].mxu1 }
  0xe5   :  { %6874 = vst [vmem:[#allocation5_spill] sm:$0xff] %v5380_v52 }
  0xe6   :  { %4503 = vmatmul.mubr.msk.bf16.gmra.mrb[108].mxu0 %vm883_vm0, %v4860_v46 }
  0xe7   :  { %4506 = vmatprep.mubr.msk.bf16.mxu0 %vm883_vm0, %v4861_v49 }
  0xe9   :  { %v5384_v53 = vpop.f32.mrb[4].mxu0  ;;  %v5386_v54 = vpop.f32.mrb[4].mxu1 }
  0xea   :  { %6875 = vst [vmem:[#allocation6_spill] sm:$0xff] %v5386_v54  ;;  %v5388_v55 = vpop.f32.mrb[5].mxu0  ;;  %v5393_v57 = vpop.f32.mrb[5].mxu1 }
  0xeb   :  { %6876 = vst [vmem:[#allocation7_spill] sm:$0xff] %v5393_v57  ;;  %v5395_v58 = vpop.f32.mrb[6].mxu0  ;;  %v5400_v60 = vpop.f32.mrb[6].mxu1 }
  0xec   :  { %6877 = vst [vmem:[#allocation8_spill] sm:$0xff] %v5400_v60  ;;  %v2153_v61 = vmax.f32 %v5364_v45, %v5395_v58  ;;  %v5404_v62 = vpop.f32.mrb[7].mxu0  ;;  %v5408_v0 = vpop.f32.mrb[7].mxu1 }
  0xed   :  { %6878 = vst [vmem:[#allocation9_spill] sm:$0xff] %v5408_v0 }
  0xee   :  { %4507 = vmatmul.mubr.msk.bf16.gmra.mrb[112].mxu0 %vm883_vm0, %v4862_v56 }
  0xef   :  { %4510 = vmatprep.mubr.msk.bf16.mxu0 %vm883_vm0, %v4863_v59 }
  0xf1   :  { %v5412_v1 = vpop.f32.mrb[8].mxu0  ;;  %v5414_v2 = vpop.f32.mrb[8].mxu1 }
  0xf2   :  { %6879 = vst [vmem:[#allocation10_spill] sm:$0xff] %v5414_v2  ;;  %v2156_v3 = vmax.f32 %v5371_v48, %v5412_v1  ;;  %v1290_v4 = vpop.f32.mrb[9].mxu0  ;;  %v5423_v7 = vpop.f32.mrb[9].mxu1 }
  0xf3   :  { %6880 = vst [vmem:[#allocation11_spill] sm:$0xff] %v5423_v7  ;;  %v2154_v8 = vmax.f32 %v5378_v51, %v1290_v4  ;;  %v5426_v9 = vpop.f32.mrb[10].mxu0  ;;  %v5433_v12 = vpop.f32.mrb[10].mxu1 }
  0xf4   :  { %6881 = vst [vmem:[#allocation12_spill] sm:$0xff] %v5433_v12  ;;  %v2157_v13 = vmax.f32 %v5388_v55, %v5426_v9  ;;  %v1293_v14 = vpop.f32.mrb[11].mxu0  ;;  %v5439_v16 = vpop.f32.mrb[11].mxu1 }
  0xf5   :  { %6882 = vst [vmem:[#allocation13_spill] sm:$0xff] %v5439_v16  ;;  %v2155_v17 = vmax.f32 %v5360_v43, %v1293_v14 }
  0xf6   :  { %4511 = vmatmul.mubr.msk.bf16.gmra.mrb[116].mxu0 %vm883_vm0, %v4864_v5 }
  0xf7   :  { %4514 = vmatprep.mubr.msk.bf16.mxu0 %vm883_vm0, %v4865_v10 }
  0xf9   :  { %v4408_v19 = vpop.f32.mrb[12].mxu0  ;;  %v5446_v20 = vpop.f32.mrb[12].mxu1 }
  0xfa   :  { %v1306_v21 = vpop.f32.mrb[13].mxu0  ;;  %v5451_v23 = vpop.f32.mrb[13].mxu1 }
  0xfb   :  { %v2158_v24 = vmax.f32 %v5404_v62, %v1306_v21  ;;  %v4409_v25 = vpop.f32.mrb[14].mxu0  ;;  %v5457_v27 = vpop.f32.mrb[14].mxu1 }
  0xfc   :  { %v1309_v28 = vpop.f32.mrb[15].mxu0  ;;  %v5459_v29 = vpop.f32.mrb[15].mxu1 }
  0xfd   :  { %v2159_v30 = vmax.f32 %v5384_v53, %v1309_v28 }
  0xfe   :  { %4515 = vmatmul.mubr.msk.bf16.gmra.mrb[120].mxu0 %vm883_vm0, %v4866_v22 }
  0xff   :  { %4518 = vmatprep.mubr.msk.bf16.mxu0 %vm883_vm0, %v4867_v26 }
 0x101   :  { %v4412_v31 = vpop.f32.mrb[16].mxu0  ;;  %v5464_v32 = vpop.f32.mrb[16].mxu1 }
 0x102   :  { %v1322_v33 = vpop.f32.mrb[17].mxu0  ;;  %v5469_v35 = vpop.f32.mrb[17].mxu1 }
 0x103   :  { %v4413_v36 = vpop.f32.mrb[18].mxu0  ;;  %v5471_v37 = vpop.f32.mrb[18].mxu1 }
 0x104   :  { %v1325_v38 = vpop.f32.mrb[19].mxu0  ;;  %v2188_v39 = vmax.f32 %v5451_v23, %v5471_v37  ;;  %v5475_v40 = vpop.f32.mrb[19].mxu1 }
 0x106   :  { %4519 = vmatmul.mubr.msk.bf16.gmra.mrb[124].mxu0 %vm883_vm0, %v4868_v34  ;;  %vm3625_vm0 = vcmask 982016  }
 0x109   :  { %v4416_v41 = vpop.f32.mrb[20].mxu0  ;;  %v5478_v42 = vpop.f32.mrb[20].mxu1 }
 0x10a   :  { %v2210_v43 = vmax.f32 %v4409_v25, %v4416_v41  ;;  %v1338_v46 = vpop.f32.mrb[21].mxu0  ;;  %v2191_v49 = vmax.f32 %v5457_v27, %v5478_v42  ;;  %v1850_v51 = vpop.f32.mrb[21].mxu1 }
 0x10b   :  { %v4417_v53 = vpop.f32.mrb[22].mxu0  ;;  %v2189_v56 = vmax.f32 %v5459_v29, %v1850_v51  ;;  %v5483_v59 = vpop.f32.mrb[22].mxu1 }
 0x10c   :  { %v5485_v62 = vmax.f32 %v2154_v8, %v2210_v43  ;;  %v2211_v4 = vmax.f32 %v1322_v33, %v4417_v53  ;;  %v1341_v5 = vpop.f32.mrb[23].mxu0  ;;  %v2192_v10 = vmax.f32 %v5469_v35, %v5483_v59  ;;  %v1853_v14 = vpop.f32.mrb[23].mxu1 }
 0x10d   :  { %v2209_v21 = vmax.f32 %v4408_v19, %v1341_v5  ;;  %v2190_v22 = vmax.f32 %v5446_v20, %v1853_v14 }
 0x10e   :  { %v5490_v23 = vmax.f32 %v2155_v17, %v2211_v4 }
 0x10f   :  { %v5495_v25 = vmax.f32 %v2153_v61, %v2209_v21 }
 0x111   :  { %v4420_v26 = vpop.f32.mrb[24].mxu0  ;;  %v4548_v28 = vpop.f32.mrb[24].mxu1 }
 0x112   :  { %v2214_v8 = vmax.f32 %v4413_v36, %v4420_v26  ;;  %v1354_v29 = vpop.f32.mrb[25].mxu0  ;;  %v1866_v33 = vpop.f32.mrb[25].mxu1 }
 0x113   :  { %v2212_v34 = vmax.f32 %v1325_v38, %v1354_v29  ;;  %v4421_v37 = vpop.f32.mrb[26].mxu0  ;;  %v2193_v41 = vmax.f32 %v5475_v40, %v1866_v33  ;;  %v4549_v43 = vpop.f32.mrb[26].mxu1 }
 0x114   :  { %v5498_v19 = vmax.f32 %v2158_v24, %v2214_v8  ;;  %v2215_v20 = vmax.f32 %v1338_v46, %v4421_v37  ;;  %v1357_v17 = vpop.f32.mrb[27].mxu0  ;;  %v1869_v51 = vpop.f32.mrb[27].mxu1 }
 0x115   :  { %v5503_v45 = vmax.f32 %v2156_v3, %v2212_v34  ;;  %v2213_v58 = vmax.f32 %v4412_v31, %v1357_v17  ;;  %v2194_v61 = vmax.f32 %v5464_v32, %v1869_v51 }
 0x116   :  { %v5506_v36 = vmax.f32 %v2159_v30, %v2215_v20 }
 0x117   :  { %v5511_v38 = vmax.f32 %v2157_v13, %v2213_v58 }
 0x119   :  { %v5513_v24 = vpop.f32.mrb[28].mxu0  ;;  %v4552_v40 = vpop.f32.mrb[28].mxu1 }
 0x11a   :  { %v5515_v46 = vpop.f32.mrb[29].mxu0  ;;  %v1882_v53 = vpop.f32.mrb[29].mxu1 }
 0x11b   :  { %v5517_v4 = vpop.f32.mrb[30].mxu0  ;;  %v4553_v48 = vpop.f32.mrb[30].mxu1 }
 0x11c   :  { %v5519_v1 = vpop.f32.mrb[31].mxu0  ;;  %v1885_v3 = vpop.f32.mrb[31].mxu1 }
 0x121   :  { %v5521_v31 = vpop.f32.mrb[32].mxu0  ;;  %v4556_v30 = vpop.f32.mrb[32].mxu1 }
 0x122   :  { %v5523_v32 = vpop.f32.mrb[33].mxu0  ;;  %v2245_v55 = vmax.f32 %v4549_v43, %v4556_v30  ;;  %v1898_v9 = vpop.f32.mrb[33].mxu1 }
 0x123   :  { %v5525_v13 = vpop.f32.mrb[34].mxu0  ;;  %v4557_v5 = vpop.f32.mrb[34].mxu1 }
 0x124   :  { %v5529_v21 = vpop.f32.mrb[35].mxu0  ;;  %v5531_v26 = vmax.f32 %v2189_v56, %v2245_v55  ;;  %v2246_v8 = vmax.f32 %v1882_v53, %v4557_v5  ;;  %v1901_v29 = vpop.f32.mrb[35].mxu1 }
 0x125   :  { %v2244_v33 = vmax.f32 %v4548_v28, %v1901_v29 }
 0x126   :  { %v5533_v34 = vmax.f32 %v2190_v22, %v2246_v8 }
 0x127   :  { %v5535_v37 = vmax.f32 %v2188_v39, %v2244_v33 }
 0x129   :  { %v5537_v20 = vpop.f32.mrb[36].mxu0  ;;  %v4560_v43 = vpop.f32.mrb[36].mxu1 }
 0x12a   :  { %v1402_v51 = vpop.f32.mrb[37].mxu0  ;;  %v2249_v58 = vmax.f32 %v4553_v48, %v4560_v43  ;;  %v1914_v30 = vpop.f32.mrb[37].mxu1 }
 0x12b   :  { %v2161_v15 = vmax.f32 %v5519_v1, %v1402_v51  ;;  %v5542_v56 = vpop.f32.mrb[38].mxu0  ;;  %v2247_v53 = vmax.f32 %v1885_v3, %v1914_v30  ;;  %v4561_v55 = vpop.f32.mrb[38].mxu1 }
 0x12c   :  { %v1405_v39 = vpop.f32.mrb[39].mxu0  ;;  %v5546_v28 = vmax.f32 %v2193_v41, %v2249_v58  ;;  %v2250_v5 = vmax.f32 %v1898_v9, %v4561_v55  ;;  %v1917_v8 = vpop.f32.mrb[39].mxu1 }
 0x12d   :  { %v2162_v29 = vmax.f32 %v5513_v24, %v1405_v39  ;;  %v5552_v48 = vmax.f32 %v2191_v49, %v2247_v53  ;;  %v2248_v1 = vmax.f32 %v4552_v40, %v1917_v8 }
 0x12e   :  { %v5554_v33 = vmax.f32 %v2194_v61, %v2250_v5 }
 0x12f   :  { %v5559_v3 = vmax.f32 %v2192_v10, %v2248_v1 }
 0x131   :  { %v4436_v43 = vpop.f32.mrb[40].mxu0  ;;  %v5561_v41 = vpop.f32.mrb[40].mxu1 }
 0x132   :  { %v1418_v9 = vpop.f32.mrb[41].mxu0  ;;  %v5563_v51 = vpop.f32.mrb[41].mxu1 }
 0x133   :  { %v2165_v24 = vmax.f32 %v5529_v21, %v1418_v9  ;;  %v4437_v58 = vpop.f32.mrb[42].mxu0  ;;  %v5566_v27 = vpop.f32.mrb[42].mxu1  ;;  %v6883_v9 = vmax.f32 %v5515_v46, %v5525_v13 }
 0x134   :  { %v1421_v42 = vpop.f32.mrb[43].mxu0  ;;  %v5568_v49 = vpop.f32.mrb[43].mxu1 }
 0x135   :  { %v2166_v61 = vmax.f32 %v5521_v31, %v1421_v42 }
 0x139   :  { %v4440_v40 = vpop.f32.mrb[44].mxu0  ;;  %v5571_v35 = vpop.f32.mrb[44].mxu1 }
 0x13a   :  { %v1434_v59 = vpop.f32.mrb[45].mxu0  ;;  %v5573_v10 = vpop.f32.mrb[45].mxu1 }
 0x13b   :  { %v4441_v30 = vpop.f32.mrb[46].mxu0  ;;  %v5575_v53 = vpop.f32.mrb[46].mxu1 }
 0x13c   :  { %v1437_v55 = vpop.f32.mrb[47].mxu0  ;;  %v5579_v39 = vpop.f32.mrb[47].mxu1  ;;  %v6890_v2 = vmax.f32 %v5563_v51, %v5575_v53 }
 0x141   :  { %v4444_v5 = vpop.f32.mrb[48].mxu0  ;;  %v5581_v8 = vpop.f32.mrb[48].mxu1 }
 0x142   :  { %v2217_v1 = vmax.f32 %v4437_v58, %v4444_v5  ;;  %v1450_v31 = vpop.f32.mrb[49].mxu0  ;;  %v1962_v42 = vpop.f32.mrb[49].mxu1 }
 0x143   :  { %v4445_v6 = vpop.f32.mrb[50].mxu0  ;;  %v2196_v63 = vmax.f32 %v5568_v49, %v1962_v42  ;;  %v5586_v18 = vpop.f32.mrb[50].mxu1  ;;  %v6884_v42 = vmax.f32 %v5517_v4, %v5537_v20 }
 0x144   :  { %v5588_v11 = vmax.f32 %v2161_v15, %v2217_v1  ;;  %v2218_v22 = vmax.f32 %v1434_v59, %v4445_v6  ;;  %v1453_v21 = vpop.f32.mrb[51].mxu0  ;;  %v1965_v14 = vpop.f32.mrb[51].mxu1  ;;  %v4869_v15 = vld [vmem:[%s6837_s1 + $0x58] sm:$0xff]  }
 0x145   :  { %v2216_v12 = vmax.f32 %v4436_v43, %v1453_v21  ;;  %v2197_v58 = vmax.f32 %v5561_v41, %v1965_v14  ;;  %v4870_v6 = vld [vmem:[%s6837_s1 + $0x18] sm:$0xff]   ;;  %4363 = vmatprep.subr.bf16.mxu1 %v4869_v15 }
 0x146   :  { %v5593_v5 = vmax.f32 %v2162_v29, %v2218_v22  ;;  %4364 = vmatpush3.bf16.msra.mxu1 %v4870_v6 }
 0x147   :  { %v5598_v57 = vmax.f32 %v6883_v9, %v2216_v12 }
 0x149   :  { %v4448_v49 = vpop.f32.mrb[52].mxu0  ;;  %v4576_v59 = vpop.f32.mrb[52].mxu1 }
 0x14a   :  { %v2221_v43 = vmax.f32 %v4441_v30, %v4448_v49  ;;  %v1466_v21 = vpop.f32.mrb[53].mxu0  ;;  %v1978_v14 = vpop.f32.mrb[53].mxu1 }
 0x14b   :  { %v2219_v22 = vmax.f32 %v1437_v55, %v1466_v21  ;;  %v4449_v29 = vpop.f32.mrb[54].mxu0  ;;  %v2200_v46 = vmax.f32 %v5579_v39, %v1978_v14  ;;  %v4577_v12 = vpop.f32.mrb[54].mxu1  ;;  %v6886_v55 = vmax.f32 %v5523_v32, %v5542_v56 }
 0x14c   :  { %v5607_v13 = vmax.f32 %v2165_v24, %v2221_v43  ;;  %v2222_v41 = vmax.f32 %v1450_v31, %v4449_v29  ;;  %v1469_v1 = vpop.f32.mrb[55].mxu0  ;;  %v1981_v9 = vpop.f32.mrb[55].mxu1 }
 0x14d   :  { %v5612_v17 = vmax.f32 %v6884_v42, %v2219_v22  ;;  %v2220_v30 = vmax.f32 %v4440_v40, %v1469_v1  ;;  %v2201_v49 = vmax.f32 %v5571_v35, %v1981_v9 }
 0x14e   :  { %v5615_v15 = vmax.f32 %v2166_v61, %v2222_v41 }
 0x14f   :  { %v5620_v39 = vmax.f32 %v6886_v55, %v2220_v30 }
 0x150   :  { %6885 = vst [vmem:[#allocation14_spill] sm:$0xff] %v5615_v15 }
 0x151   :  { %6887 = vst [vmem:[#allocation15_spill] sm:$0xff] %v5620_v39  ;;  %v5622_v24 = vpop.f32.mrb[56].mxu0  ;;  %v4580_v31 = vpop.f32.mrb[56].mxu1 }
 0x152   :  { %v5624_v6 = vpop.f32.mrb[57].mxu0  ;;  %v1994_v43 = vpop.f32.mrb[57].mxu1 }
 0x153   :  { %v5626_v21 = vpop.f32.mrb[58].mxu0  ;;  %v4581_v4 = vpop.f32.mrb[58].mxu1 }
 0x154   :  { %v5628_v20 = vpop.f32.mrb[59].mxu0  ;;  %v1997_v40 = vpop.f32.mrb[59].mxu1 }
 0x159   :  { %v5630_v35 = vpop.f32.mrb[60].mxu0  ;;  %v4584_v61 = vpop.f32.mrb[60].mxu1 }
 0x15a   :  { %v5632_v14 = vpop.f32.mrb[61].mxu0  ;;  %v2252_v32 = vmax.f32 %v4577_v12, %v4584_v61  ;;  %v2010_v56 = vpop.f32.mrb[61].mxu1 }
 0x15b   :  { %v5634_v22 = vpop.f32.mrb[62].mxu0  ;;  %v4585_v29 = vpop.f32.mrb[62].mxu1 }
 0x15c   :  { %v5638_v1 = vpop.f32.mrb[63].mxu0  ;;  %v5640_v9 = vmax.f32 %v2196_v63, %v2252_v32  ;;  %v2253_v42 = vmax.f32 %v1994_v43, %v4585_v29  ;;  %v2013_v30 = vpop.f32.mrb[63].mxu1 }
 0x15d   :  { %v2251_v55 = vmax.f32 %v4576_v59, %v2013_v30 }
 0x15e   :  { %6888 = vst [vmem:[#allocation16_spill] sm:$0xff] %v5640_v9  ;;  %v5642_v54 = vmax.f32 %v2197_v58, %v2253_v42 }
 0x15f   :  { %v5647_v12 = vmax.f32 %v6890_v2, %v2251_v55 }
 0x160   :  { %6889 = vst [vmem:[#allocation17_spill] sm:$0xff] %v5642_v54 }
 0x161   :  { %6891 = vst [vmem:[#allocation18_spill] sm:$0xff] %v5647_v12  ;;  %v5649_v61 = vpop.f32.mrb[64].mxu0  ;;  %v4588_v50 = vpop.f32.mrb[64].mxu1 }
 0x162   :  { %v1514_v0 = vpop.f32.mrb[65].mxu0  ;;  %v2256_v60 = vmax.f32 %v4581_v4, %v4588_v50  ;;  %v2026_v63 = vpop.f32.mrb[65].mxu1  ;;  %v6893_v50 = vmax.f32 %v5566_v27, %v5581_v8 }
 0x163   :  { %v2168_v43 = vmax.f32 %v5628_v20, %v1514_v0  ;;  %v5654_v32 = vpop.f32.mrb[66].mxu0  ;;  %v2254_v58 = vmax.f32 %v1997_v40, %v2026_v63  ;;  %v4589_v59 = vpop.f32.mrb[66].mxu1  ;;  %v4871_v20 = vld [vmem:[%s6837_s1 + $0x60] sm:$0xff]  }
 0x164   :  { %v1517_v2 = vpop.f32.mrb[67].mxu0  ;;  %v5658_v53 = vmax.f32 %v2200_v46, %v2256_v60  ;;  %v2257_v29 = vmax.f32 %v2010_v56, %v4589_v59  ;;  %v2029_v42 = vpop.f32.mrb[67].mxu1  ;;  %v6896_v60 = vmax.f32 %v5573_v10, %v5586_v18  ;;  %4365 = vmatprep.subr.bf16.mxu1 %v4871_v20  ;;  %v2321_v10 = vlaneseq }
 0x165   :  { %v2169_v30 = vmax.f32 %v5622_v24, %v1517_v2  ;;  %v5664_v4 = vmax.f32 %v6893_v50, %v2254_v58  ;;  %v2255_v0 = vmax.f32 %v4580_v31, %v2029_v42  ;;  %v4872_v24 = vld [vmem:[%s6837_s1 + $0x20] sm:$0xff]   ;;  %v4873_v2 = vld [vmem:[%s6837_s1 + $0x68] sm:$0xff]   ;;  %v5703_v42 = vld [vmem:[%s6837_s1 + $0x10] sm:$0x4] }
 0x166   :  { %6892 = vst [vmem:[#allocation19_spill] sm:$0xff] %v5658_v53  ;;  %v5669_v40 = vmax.f32 %v2201_v49, %v2257_v29  ;;  %4366 = vmatpush3.bf16.msra.mxu1 %v4872_v24  ;;  %v5698_v29 = vshrl.u32 %v2321_v10, 7  ;;  %6899 = vst [vmem:[#allocation24_spill] sm:$0xff] %v5703_v42  ;;  %v4874_v10 = vld [vmem:[%s6837_s1 + $0x28] sm:$0xff]   ;;  %v6851_v59 = vunpack.c.l.bf16 %v5703_v42 }
 0x167   :  { %6894 = vst [vmem:[#allocation20_spill] sm:$0xff] %v5664_v4  ;;  %v5674_v46 = vmax.f32 %v6896_v60, %v2255_v0  ;;  %4367 = vmatprep.subr.bf16.mxu1 %v4873_v2 }
 0x168   :  { %6895 = vst [vmem:[#allocation21_spill] sm:$0xff] %v5669_v40  ;;  %6898 = vst [vmem:[#allocation23_spill] sm:$0xff] %v5698_v29  ;;  %v2323_v41 = vsub.s32 4, %v5698_v29 }
 0x169   :  { %6897 = vst [vmem:[#allocation22_spill] sm:$0xff] %v5674_v46  ;;  %v4464_v27 = vpop.f32.mrb[68].mxu0  ;;  %v5679_v8 = vpop.f32.mrb[68].mxu1 }
 0x16a   :  { %v5681_v31 = vpop.f32.mrb[69].mxu0  ;;  %v5683_v56 = vpop.f32.mrb[69].mxu1  ;;  %4368 = vmatpush3.bf16.msra.mxu1 %v4874_v10  ;;  %v5724_v2 = vrot.slane %v6851_v59, %v2323_v41 }
 0x16b   :  { %v4465_v55 = vpop.f32.mrb[70].mxu0  ;;  %v5687_v18 = vpop.f32.mrb[70].mxu1 }
 0x16c   :  { %v5689_v63 = vpop.f32.mrb[71].mxu0  ;;  %v5691_v58 = vpop.f32.mrb[71].mxu1  ;;  %v2326_v41 = vadd.f32 %v5724_v2, %v5485_v62  ;;  %v2327_v40 = vadd.f32 %v5724_v2, %v5490_v23  ;;  %v6900_v62 = vmax.f32 %v5624_v6, %v5634_v22 }
 0x16e   :  { %v2383_v29 = vmax.f32 %v2327_v40, 0.0 }
 0x171   :  { %v5705_v50 = vpop.f32.mrb[72].mxu0  ;;  %v5707_v0 = vpop.f32.mrb[72].mxu1 }
 0x172   :  { %v1546_v20 = vpop.f32.mrb[73].mxu0  ;;  %v5709_v60 = vpop.f32.mrb[73].mxu1 }
 0x173   :  { %v4469_v24 = vpop.f32.mrb[74].mxu0  ;;  %v5711_v51 = vpop.f32.mrb[74].mxu1 }
 0x174   :  { %v1549_v49 = vpop.f32.mrb[75].mxu0  ;;  %v5720_v16 = vpop.f32.mrb[75].mxu1 }
 0x179   :  { %v4472_v44 = vpop.f32.mrb[76].mxu0  ;;  %v5726_v7 = vpop.f32.mrb[76].mxu1 }
 0x17a   :  { %v2224_v52 = vmax.f32 %v4465_v55, %v4472_v44  ;;  %v1562_v46 = vpop.f32.mrb[77].mxu0  ;;  %v5730_v4 = vpop.f32.mrb[77].mxu1 }
 0x17b   :  { %v4473_v53 = vpop.f32.mrb[78].mxu0  ;;  %v5734_v12 = vpop.f32.mrb[78].mxu1 }
 0x17c   :  { %v2280_v10 = vmax.f32 %v2168_v43, %v2224_v52  ;;  %v2225_v59 = vmax.f32 %v1546_v20, %v4473_v53  ;;  %v1565_v42 = vpop.f32.mrb[79].mxu0  ;;  %v5740_v55 = vpop.f32.mrb[79].mxu1  ;;  %v2325_v52 = vadd.f32 %v5724_v2, %v5495_v25  ;;  %v2382_v53 = vmax.f32 %v2326_v41, 0.0 }
 0x17d   :  { %v2223_v54 = vmax.f32 %v4464_v27, %v1565_v42  ;;  %v2330_v41 = vadd.f32 %v5724_v2, %v5498_v19  ;;  %v6902_v19 = vmax.f32 %v5626_v21, %v5649_v61  ;;  %v6903_v21 = vmax.f32 %v5630_v35, %v5689_v63 }
 0x17e   :  { %v2340_v9 = vadd.f32 %v5724_v2, %v2280_v10  ;;  %v2281_v39 = vmax.f32 %v2169_v30, %v2225_v59 }
 0x17f   :  { %v2279_v43 = vmax.f32 %v6900_v62, %v2223_v54  ;;  %v2381_v54 = vmax.f32 %v2325_v52, 0.0  ;;  %v2328_v62 = vadd.f32 %v5724_v2, %v5503_v45 }
 0x180   :  { %v2396_v20 = vmax.f32 %v2340_v9, 0.0  ;;  %v2341_v44 = vadd.f32 %v5724_v2, %v2281_v39 }
 0x181   :  { %v2339_v23 = vadd.f32 %v5724_v2, %v2279_v43  ;;  %v4476_v27 = vpop.f32.mrb[80].mxu0  ;;  %v5754_v42 = vpop.f32.mrb[80].mxu1 }
 0x182   :  { %v5756_v47 = vcombine.low %v2382_v53, %v2396_v20  ;;  %v5758_v30 = vcombine.high %v2382_v53, %v2396_v20  ;;  %v2397_v59 = vmax.f32 %v2341_v44, 0.0  ;;  %v2228_v25 = vmax.f32 %v4469_v24, %v4476_v27  ;;  %v1578_v10 = vpop.f32.mrb[81].mxu0  ;;  %v5760_v15 = vpop.f32.mrb[81].mxu1 }
 0x183   :  { %v2395_v6 = vmax.f32 %v2339_v23, 0.0  ;;  %v2226_v22 = vmax.f32 %v1549_v49, %v1578_v10  ;;  %v4477_v9 = vpop.f32.mrb[82].mxu0  ;;  %v4605_v40 = vpop.f32.mrb[82].mxu1  ;;  %v6901_v20 = vmax.f32 %v5638_v1, %v5681_v31  ;;  %v2329_v1 = vadd.f32 %v5724_v2, %v5511_v38 }
 0x184   :  { %v5768_v43 = vcombine.low %v2383_v29, %v2397_v59  ;;  %v5770_v24 = vcombine.high %v2383_v29, %v2397_v59  ;;  %v1581_v44 = vpop.f32.mrb[83].mxu0  ;;  %v5772_v53 = vpop.f32.mrb[83].mxu1  ;;  %v2229_v45 = vmax.f32 %v1562_v46, %v4477_v9  ;;  %v2331_v29 = vadd.f32 %v5724_v2, %v5506_v36 }
 0x185   :  { %v5774_v52 = vcombine.low %v2381_v54, %v2395_v6  ;;  %v5776_v49 = vcombine.high %v2381_v54, %v2395_v6  ;;  %v2284_v23 = vmax.f32 %v6901_v20, %v2228_v25  ;;  %v2282_v27 = vmax.f32 %v6902_v19, %v2226_v22  ;;  %v4875_v54 = vld [vmem:[%s6837_s1 + $0x70] sm:$0xff]  }
 0x186   :  { %v2227_v10 = vmax.f32 %v5705_v50, %v1581_v44  ;;  %v2285_v61 = vmax.f32 %v6903_v21, %v2229_v45  ;;  %v6904_v46 = vmax.f32 %v5632_v14, %v5654_v32  ;;  %v2386_v50 = vmax.f32 %v2330_v41, 0.0  ;;  %4369 = vmatprep.subr.bf16.mxu1 %v4875_v54  ;;  %v4876_v19 = vld [vmem:[%s6837_s1 + $0x30] sm:$0xff]  }
 0x187   :  { %v2344_v59 = vadd.f32 %v5724_v2, %v2284_v23  ;;  %v2342_v39 = vadd.f32 %v5724_v2, %v2282_v27  ;;  %v2384_v25 = vmax.f32 %v2328_v62, 0.0  ;;  %v2387_v27 = vmax.f32 %v2331_v29, 0.0  ;;  %4370 = vmatpush3.bf16.msra.mxu1 %v4876_v19 }
 0x188   :  { %v2283_v31 = vmax.f32 %v6904_v46, %v2227_v10  ;;  %v2345_v38 = vadd.f32 %v5724_v2, %v2285_v61  ;;  %v2385_v45 = vmax.f32 %v2329_v1, 0.0  ;;  %v2361_v19 = vadd.f32 %v5724_v2, %v5531_v26 }
 0x189   :  { %v2400_v6 = vmax.f32 %v2344_v59, 0.0  ;;  %v2398_v22 = vmax.f32 %v2342_v39, 0.0  ;;  %v5802_v9 = vpop.f32.mrb[84].mxu0  ;;  %v5804_v44 = vpop.f32.mrb[84].mxu1 }
 0x18a   :  { %v2343_v35 = vadd.f32 %v5724_v2, %v2283_v31  ;;  %v5808_v63 = vpop.f32.mrb[85].mxu0  ;;  %v2106_v14 = vpop.f32.mrb[85].mxu1  ;;  %v2401_v10 = vmax.f32 %v2345_v38, 0.0 }
 0x18b   :  { %v5810_v32 = vcombine.low %v2386_v50, %v2400_v6  ;;  %v5812_v20 = vcombine.high %v2386_v50, %v2400_v6  ;;  %v5814_v41 = vcombine.low %v2384_v25, %v2398_v22  ;;  %v5816_v62 = vcombine.high %v2384_v25, %v2398_v22  ;;  %v5818_v39 = vpop.f32.mrb[86].mxu0  ;;  %v4609_v23 = vpop.f32.mrb[86].mxu1 }
 0x18c   :  { %v2399_v59 = vmax.f32 %v2343_v35, 0.0  ;;  %v5823_v54 = vpop.f32.mrb[87].mxu0  ;;  %v2109_v21 = vpop.f32.mrb[87].mxu1  ;;  %v5825_v61 = vcombine.low %v2387_v27, %v2401_v10  ;;  %v5827_v46 = vcombine.high %v2387_v27, %v2401_v10  ;;  %v6908_v27 = vmax.f32 %v5691_v58, %v5730_v4 }
 0x18d   :  { %v6909_v4 = vmax.f32 %v5679_v8, %v5740_v55 }
 0x18e   :  { %6905 = vst [vmem:[#allocation25_spill] sm:$0xff] %v5827_v46  ;;  %v5829_v31 = vcombine.low %v2385_v45, %v2399_v59  ;;  %v5831_v50 = vcombine.high %v2385_v45, %v2399_v59 }
 0x190   :  { %6906 = vst [vmem:[#allocation26_spill] sm:$0xff] %v5829_v31  ;;  %6907 = vst [vmem:[#allocation27_spill] sm:$0xff] %v5831_v50  ;;  %v2360_v50 = vadd.f32 %v5724_v2, %v5535_v37  ;;  %v2365_v37 = vadd.f32 %v5724_v2, %v5546_v28 }
 0x191   :  { %v5833_v25 = vpop.f32.mrb[88].mxu0  ;;  %v4612_v6 = vpop.f32.mrb[88].mxu1 }
 0x192   :  { %v2259_v22 = vmax.f32 %v4605_v40, %v4612_v6  ;;  %v5835_v29 = vpop.f32.mrb[89].mxu0  ;;  %v2122_v1 = vpop.f32.mrb[89].mxu1  ;;  %v2362_v6 = vadd.f32 %v5724_v2, %v5533_v34  ;;  %v2416_v46 = vmax.f32 %v2360_v50, 0.0 }
 0x193   :  { %v5837_v38 = vpop.f32.mrb[90].mxu0  ;;  %v4613_v35 = vpop.f32.mrb[90].mxu1 }
 0x194   :  { %v2315_v10 = vmax.f32 %v6908_v27, %v2259_v22  ;;  %v2260_v59 = vmax.f32 %v2106_v14, %v4613_v35  ;;  %v5846_v36 = vpop.f32.mrb[91].mxu0  ;;  %v2125_v40 = vpop.f32.mrb[91].mxu1  ;;  %v6910_v14 = vmax.f32 %v5683_v56, %v5711_v51  ;;  %v2417_v35 = vmax.f32 %v2361_v19, 0.0 }
 0x195   :  { %v2258_v31 = vmax.f32 %v5754_v42, %v2125_v40  ;;  %v2418_v34 = vmax.f32 %v2362_v6, 0.0 }
 0x196   :  { %v2375_v26 = vadd.f32 %v5724_v2, %v2315_v10  ;;  %v2316_v58 = vmax.f32 %v6909_v4, %v2260_v59 }
 0x197   :  { %v2314_v22 = vmax.f32 %v6910_v14, %v2258_v31 }
 0x198   :  { %v2431_v27 = vmax.f32 %v2375_v26, 0.0  ;;  %v2376_v45 = vadd.f32 %v5724_v2, %v2316_v58  ;;  %v2363_v58 = vadd.f32 %v5724_v2, %v5552_v48  ;;  %v5978_v48 = vadd.f32 %v5724_v2, %v5607_v13 }
 0x199   :  { %v2374_v42 = vadd.f32 %v5724_v2, %v2314_v22  ;;  %v5864_v10 = vpop.f32.mrb[92].mxu0  ;;  %v4616_v40 = vpop.f32.mrb[92].mxu1 }
 0x19a   :  { %v5866_v8 = vcombine.low %v2417_v35, %v2431_v27  ;;  %v5868_v55 = vcombine.high %v2417_v35, %v2431_v27  ;;  %v2432_v51 = vmax.f32 %v2376_v45, 0.0  ;;  %v5872_v31 = vpop.f32.mrb[93].mxu0  ;;  %v2138_v19 = vpop.f32.mrb[93].mxu1  ;;  %v2263_v59 = vmax.f32 %v4609_v23, %v4616_v40 }
 0x19b   :  { %v2430_v50 = vmax.f32 %v2374_v42, 0.0  ;;  %v2261_v6 = vmax.f32 %v2109_v21, %v2138_v19  ;;  %v5876_v26 = vpop.f32.mrb[94].mxu0  ;;  %v4617_v4 = vpop.f32.mrb[94].mxu1  ;;  %v6913_v21 = vmax.f32 %v5720_v16, %v5760_v15  ;;  %v6914_v40 = vmax.f32 %v5687_v18, %v5726_v7  ;;  %v6928_v18 = vld [vmem:[#allocation16_spill] sm:$0xff] }
 0x19c   :  { %v5880_v14 = vcombine.low %v2418_v34, %v2432_v51  ;;  %v5882_v45 = vcombine.high %v2418_v34, %v2432_v51  ;;  %v5884_v22 = vpop.f32.mrb[95].mxu0  ;;  %v2141_v35 = vpop.f32.mrb[95].mxu1  ;;  %v2264_v34 = vmax.f32 %v2122_v1, %v4617_v4  ;;  %v2421_v51 = vmax.f32 %v2365_v37, 0.0 }
 0x19d   :  { %v5886_v27 = vcombine.low %v2416_v46, %v2430_v50  ;;  %v5888_v23 = vcombine.high %v2416_v46, %v2430_v50  ;;  %v2319_v42 = vmax.f32 %v6913_v21, %v2263_v59  ;;  %v2317_v19 = vmax.f32 %v6914_v40, %v2261_v6  ;;  %v4877_v46 = vld [vmem:[%s6837_s1 + $0x78] sm:$0xff]  }
 0x19e   :  { %v2366_v16 = vadd.f32 %v5724_v2, %v5554_v33  ;;  %v6915_v7 = vmax.f32 %v5707_v0, %v5772_v53  ;;  %v2262_v1 = vmax.f32 %v5804_v44, %v2141_v35  ;;  %v2419_v37 = vmax.f32 %v2363_v58, 0.0  ;;  %4371 = vmatprep.subr.bf16.mxu1 %v4877_v46 }
 0x19f   :  { %6911 = vst [vmem:[#allocation28_spill] sm:$0xff] %v5886_v27  ;;  %6912 = vst [vmem:[#allocation29_spill] sm:$0xff] %v5888_v23  ;;  %v2379_v56 = vadd.f32 %v5724_v2, %v2319_v42  ;;  %v2377_v28 = vadd.f32 %v5724_v2, %v2317_v19  ;;  %v2364_v50 = vadd.f32 %v5724_v2, %v5559_v3 }
 0x1a0   :  { %v2320_v15 = vmax.f32 %v6915_v7, %v2264_v34  ;;  %v6916_v0 = vmax.f32 %v5709_v60, %v5734_v12  ;;  %v2422_v35 = vmax.f32 %v2366_v16, 0.0  ;;  %v6925_v16 = vld [vmem:[#allocation14_spill] sm:$0xff]  ;;  %v6926_v60 = vld [vmem:[#allocation23_spill] sm:$0xff] }
 0x1a1   :  { %v2435_v59 = vmax.f32 %v2379_v56, 0.0  ;;  %v2433_v6 = vmax.f32 %v2377_v28, 0.0  ;;  %v5913_v4 = vpop.f32.mrb[96].mxu0  ;;  %v4878_v28 = vld [vmem:[%s6837_s1 + $0x38] sm:$0xff]   ;;  %v2420_v34 = vmax.f32 %v2364_v50, 0.0 }
 0x1a2   :  { %v2380_v33 = vadd.f32 %v5724_v2, %v2320_v15  ;;  %v2318_v53 = vmax.f32 %v6916_v0, %v2262_v1  ;;  %v5919_v21 = vpop.f32.mrb[97].mxu0  ;;  %4372 = vmatpush3.bf16.msra.mxu1 %v4878_v28  ;;  %v4879_v28 = vld [vmem:[%s6837_s1 + $0x80] sm:$0xff]  }
 0x1a3   :  { %v5921_v42 = vcombine.low %v2421_v51, %v2435_v59  ;;  %v5923_v44 = vcombine.high %v2421_v51, %v2435_v59  ;;  %v5925_v58 = vcombine.low %v2419_v37, %v2433_v6  ;;  %v5927_v3 = vcombine.high %v2419_v37, %v2433_v6  ;;  %v5929_v56 = vpop.f32.mrb[98].mxu0  ;;  %4373 = vmatprep.subr.bf16.mxu1 %v4879_v28  ;;  %v6927_v28 = vld [vmem:[#allocation15_spill] sm:$0xff] }
 0x1a4   :  { %v2436_v40 = vmax.f32 %v2380_v33, 0.0  ;;  %v2378_v12 = vadd.f32 %v5724_v2, %v2318_v53  ;;  %v5937_v19 = vpop.f32.mrb[99].mxu0  ;;  %v4899_v51 = vmov 1983009808   ;;  %v4900_v6 = vmov 1934713408  }
 0x1a5   :  { %6917 = vst [vmem:[#allocation30_spill] sm:$0xff] %v5921_v42  ;;  %6918 = vst [vmem:[#allocation31_spill] sm:$0xff] %v5923_v44  ;;  %v2440_v46 = vunpack.c.l.s4 %v4899_v51  ;;  %v2504_v33 = vunpack.c.l.s4 %v4900_v6  ;;  %v5974_v6 = vadd.f32 %v5724_v2, %v5598_v57  ;;  %v4882_v57 = vld [vmem:[%s6837_s1 + $0x48] sm:$0xff]   ;;  %v5996_v13 = vadd.f32 %v5724_v2, %v6927_v28  ;;  %v6932_v28 = vld [vmem:[#allocation20_spill] sm:$0xff] }
 0x1a6   :  { %6919 = vst [vmem:[#allocation32_spill] sm:$0xff] %v5925_v58  ;;  %6920 = vst [vmem:[#allocation33_spill] sm:$0xff] %v5927_v3  ;;  %v5939_v7 = vcombine.low %v2422_v35, %v2436_v40  ;;  %v5941_v15 = vcombine.high %v2422_v35, %v2436_v40  ;;  %v2434_v1 = vmax.f32 %v2378_v12, 0.0  ;;  %v4880_v35 = vld [vmem:[%s6837_s1 + $0x40] sm:$0xff]   ;;  %v4881_v40 = vld [vmem:[%s6837_s1 + $0x88] sm:$0xff]   ;;  %v5964_v12 = vadd.f32 %v5724_v2, %v5588_v11 }
 0x1a7   :  { %v2441_v50 = vunpack.c.0.s8 %v2440_v46  ;;  %v2505_v46 = vunpack.c.0.s8 %v2504_v33  ;;  %v5982_v11 = vadd.f32 %v5724_v2, %v5612_v17  ;;  %v5986_v33 = vadd.f32 %v5724_v2, %v6925_v16  ;;  %4374 = vmatpush3.bf16.msra.mxu1 %v4880_v35 }
 0x1a8   :  { %6921 = vst [vmem:[#allocation34_spill] sm:$0xff] %v5939_v7  ;;  %6922 = vst [vmem:[#allocation35_spill] sm:$0xff] %v5941_v15  ;;  %v5945_v37 = vcombine.low %v2420_v34, %v2434_v1  ;;  %v5947_v59 = vcombine.high %v2420_v34, %v2434_v1  ;;  %v5970_v1 = vadd.f32 %v5724_v2, %v5593_v5  ;;  %4375 = vmatprep.subr.bf16.mxu1 %v4881_v40  ;;  %v6931_v15 = vld [vmem:[#allocation19_spill] sm:$0xff] }
 0x1a9   :  { %v5949_v0 = vpop.f32.mrb[100].mxu0  ;;  %v5989_v5 = vsub.s32 %v2441_v50, %v6926_v60  ;;  %v6000_v17 = vadd.f32 %v5724_v2, %v6928_v18  ;;  %v2389_v35 = vmax.f32 %v5964_v12, 0.0  ;;  %v6013_v7 = vadd.f32 %v5724_v2, %v6931_v15  ;;  %v6935_v12 = vld [vmem:[#allocation22_spill] sm:$0xff] }
 0x1aa   :  { %6923 = vst [vmem:[#allocation36_spill] sm:$0xff] %v5945_v37  ;;  %6924 = vst [vmem:[#allocation37_spill] sm:$0xff] %v5947_v59  ;;  %v1658_v53 = vpop.f32.mrb[101].mxu0  ;;  %v6929_v59 = vld [vmem:[#allocation17_spill] sm:$0xff]  ;;  %v6930_v37 = vld [vmem:[#allocation18_spill] sm:$0xff]  ;;  %v6017_v3 = vadd.f32 %v5724_v2, %v6932_v28  ;;  %v6020_v18 = vsub.s32 %v2505_v46, %v6926_v60  ;;  %v2388_v58 = vmax.f32 %v5974_v6, 0.0  ;;  %v6030_v44 = vadd.f32 %v5724_v2, %v6935_v12 }
 0x1ab   :  { %v5951_v51 = vpop.f32.mrb[102].mxu0  ;;  %v6004_v16 = vadd.f32 %v5724_v2, %v6929_v59  ;;  %v6008_v50 = vadd.f32 %v5724_v2, %v6930_v37  ;;  %v2390_v59 = vmax.f32 %v5970_v1, 0.0  ;;  %v6934_v37 = vld [vmem:[#allocation21_spill] sm:$0xff]  ;;  %4376 = vmatpush3.bf16.msra.mxu1 %v4882_v57  ;;  %v2392_v6 = vmax.f32 %v5996_v13, 0.0 }
 0x1ac   :  { %v5966_v34 = vpop.f32.mrb[103].mxu0  ;;  %6933 = vst [vmem:[#allocation14_spill] sm:$0xff] %v6020_v18  ;;  %v6026_v40 = vadd.f32 %v5724_v2, %v6934_v37  ;;  %v6936_v46 = vmax.f32 %v5823_v54, %v5872_v31  ;;  %v6047_v57 = vrot.slane %v5756_v47, %v5989_v5  ;;  %v6054_v27 = vrot.slane %v5758_v30, %v5989_v5 }
 0x1ad   :  { %v6058_v54 = vrot.slane %v5768_v43, %v5989_v5  ;;  %v6937_v47 = vmax.f32 %v5802_v9, %v5884_v22  ;;  %v6074_v30 = vrot.slane %v5776_v49, %v5989_v5  ;;  %v6938_v43 = vmax.f32 %v5808_v63, %v5837_v38 }
 0x1ae   :  { %v6081_v9 = vrot.slane %v5810_v32, %v5989_v5  ;;  %v6094_v49 = vrot.slane %v5816_v62, %v5989_v5  ;;  %v6098_v63 = vrot.slane %v5825_v61, %v5989_v5  ;;  %v6940_v62 = vld [vmem:[#allocation26_spill] sm:$0xff] }
 0x1b1   :  { %v4500_v15 = vpop.f32.mrb[104].mxu0 }
 0x1b2   :  { %v2231_v60 = vmax.f32 %v5929_v56, %v4500_v15  ;;  %v1674_v1 = vpop.f32.mrb[105].mxu0 }
 0x1b3   :  { %v4501_v23 = vpop.f32.mrb[106].mxu0 }
 0x1b4   :  { %v2287_v28 = vmax.f32 %v6936_v46, %v2231_v60  ;;  %v2232_v56 = vmax.f32 %v1658_v53, %v4501_v23  ;;  %v1677_v15 = vpop.f32.mrb[107].mxu0  ;;  %v6066_v60 = vrot.slane %v5770_v24, %v5989_v5  ;;  %v6085_v24 = vrot.slane %v5812_v20, %v5989_v5 }
 0x1b5   :  { %v2230_v12 = vmax.f32 %v5913_v4, %v1677_v15  ;;  %v6070_v4 = vrot.slane %v5774_v52, %v5989_v5 }
 0x1b6   :  { %v2347_v31 = vadd.f32 %v5724_v2, %v2287_v28  ;;  %v2288_v23 = vmax.f32 %v6937_v47, %v2232_v56  ;;  %v6090_v28 = vrot.slane %v5814_v41, %v5989_v5  ;;  %v6939_v41 = vld [vmem:[#allocation25_spill] sm:$0xff]  ;;  %v6108_v47 = vrot.slane %v6940_v62, %v5989_v5 }
 0x1b7   :  { %v2286_v53 = vmax.f32 %v6938_v43, %v2230_v12  ;;  %v6943_v62 = vmax.f32 %v5846_v36, %v5919_v21 }
 0x1b8   :  { %v2403_v22 = vmax.f32 %v2347_v31, 0.0  ;;  %v2348_v52 = vadd.f32 %v5724_v2, %v2288_v23  ;;  %v6104_v31 = vrot.slane %v6939_v41, %v5989_v5 }
 0x1b9   :  { %v2346_v32 = vadd.f32 %v5724_v2, %v2286_v53  ;;  %v4504_v38 = vpop.f32.mrb[108].mxu0  ;;  %v6941_v53 = vld [vmem:[#allocation27_spill] sm:$0xff] }
 0x1ba   :  { %v2589_v20 = vcombine.low %v2389_v35, %v2403_v22  ;;  %v2590_v46 = vcombine.high %v2389_v35, %v2403_v22  ;;  %v2404_v12 = vmax.f32 %v2348_v52, 0.0  ;;  %v2235_v56 = vmax.f32 %v5951_v51, %v4504_v38  ;;  %v1690_v15 = vpop.f32.mrb[109].mxu0 }
 0x1bb   :  { %v2402_v23 = vmax.f32 %v2346_v32, 0.0  ;;  %v2233_v61 = vmax.f32 %v5966_v34, %v1690_v15  ;;  %v4505_v43 = vpop.f32.mrb[110].mxu0  ;;  %v6113_v37 = vrot.slane %v6941_v53, %v5989_v5  ;;  %v6117_v51 = vrot.slane %v5866_v8, %v5989_v5 }
 0x1bc   :  { %v2725_v35 = vcombine.low %v2390_v59, %v2404_v12  ;;  %v2726_v22 = vcombine.high %v2390_v59, %v2404_v12  ;;  %v1693_v52 = vpop.f32.mrb[111].mxu0  ;;  %v2291_v32 = vmax.f32 %v6943_v62, %v2235_v56  ;;  %v6944_v34 = vmax.f32 %v5818_v39, %v5864_v10 }
 0x1bd   :  { %6942 = vst [vmem:[#allocation15_spill] sm:$0xff] %v6117_v51  ;;  %v2453_v38 = vcombine.low %v2388_v58, %v2402_v23  ;;  %v2454_v41 = vcombine.high %v2388_v58, %v2402_v23  ;;  %v6127_v53 = vrot.slane %v5868_v55, %v5989_v5  ;;  %v2236_v18 = vmax.f32 %v1674_v1, %v4505_v43 }
 0x1be   :  { %v2289_v15 = vmax.f32 %v6944_v34, %v2233_v61  ;;  %v6130_v8 = vrot.slane %v2725_v35, %v5989_v5  ;;  %v2234_v59 = vmax.f32 %v5949_v0, %v1693_v52  ;;  %v6135_v58 = vrot.slane %v5880_v14, %v5989_v5 }
 0x1bf   :  { %6945 = vst [vmem:[#allocation16_spill] sm:$0xff] %v6127_v53  ;;  %v6138_v36 = vrot.slane %v2453_v38, %v5989_v5  ;;  %v2351_v39 = vadd.f32 %v5724_v2, %v2291_v32  ;;  %v6946_v55 = vmax.f32 %v5833_v25, %v5937_v19  ;;  %v6947_v1 = vmax.f32 %v5835_v29, %v5876_v26  ;;  %v6961_v25 = vld [vmem:[#allocation33_spill] sm:$0xff] }
 0x1c0   :  { %v2349_v10 = vadd.f32 %v5724_v2, %v2289_v15  ;;  %v2774_v0 = vcombine.high %v6058_v54, %v6130_v8  ;;  %v6159_v19 = vrot.slane %v2726_v22, %v5989_v5  ;;  %v6162_v29 = vrot.slane %v2454_v41, %v5989_v5 }
 0x1c1   :  { %v2292_v21 = vmax.f32 %v6946_v55, %v2236_v18  ;;  %v2290_v12 = vmax.f32 %v6947_v1, %v2234_v59  ;;  %v2407_v56 = vmax.f32 %v2351_v39, 0.0  ;;  %v6152_v61 = vpop.f32.mrb[112].mxu0  ;;  %v6948_v52 = vmax.f32 %v5978_v48, 0.0 }
 0x1c2   :  { %v2405_v23 = vmax.f32 %v2349_v10, 0.0  ;;  %v6166_v35 = vpop.f32.mrb[113].mxu0  ;;  %v6950_v34 = vmax.f32 %v5982_v11, 0.0  ;;  %v6180_v39 = vrot.slane %v5882_v45, %v5989_v5  ;;  %v6952_v10 = vld [vmem:[#allocation28_spill] sm:$0xff]  ;;  %v6192_v11 = vrot.slane %v2590_v46, %v5989_v5 }
 0x1c3   :  { %v2352_v26 = vadd.f32 %v5724_v2, %v2292_v21  ;;  %v2350_v18 = vadd.f32 %v5724_v2, %v2290_v12  ;;  %v3133_v38 = vcombine.low %v6948_v52, %v2407_v56  ;;  %v6949_v62 = vmov %v6948_v52  ;;  %v6176_v41 = vpop.f32.mrb[114].mxu0 }
 0x1c4   :  { %v3134_v32 = vcombine.high %v6949_v62, %v2407_v56  ;;  %v2861_v15 = vcombine.low %v6950_v34, %v2405_v23  ;;  %v6951_v22 = vmov %v6950_v34  ;;  %v6184_v55 = vrot.slane %v6952_v10, %v5989_v5  ;;  %v6186_v48 = vpop.f32.mrb[115].mxu0 }
 0x1c5   :  { %v2862_v59 = vcombine.high %v6951_v22, %v2405_v23  ;;  %v2408_v21 = vmax.f32 %v2352_v26, 0.0  ;;  %v2406_v1 = vmax.f32 %v2350_v18, 0.0  ;;  %v6189_v12 = vrot.slane %v2589_v20, %v5989_v5 }
 0x1c6   :  { %v6195_v56 = vrot.slane %v2861_v15, %v5989_v5  ;;  %v6953_v23 = vmax.f32 %v5986_v33, 0.0  ;;  %v2517_v46 = vcombine.low %v6074_v30, %v6162_v29  ;;  %v2789_v34 = vcombine.low %v6066_v60, %v6159_v19  ;;  %v6955_v33 = vld [vmem:[#allocation29_spill] sm:$0xff] }
 0x1c7   :  { %v6198_v45 = vrot.slane %v2862_v59, %v5989_v5  ;;  %v2997_v62 = vcombine.low %v2392_v6, %v2406_v1  ;;  %v2998_v20 = vcombine.high %v2392_v6, %v2406_v1  ;;  %v2518_v15 = vcombine.high %v6074_v30, %v6162_v29  ;;  %v6958_v6 = vld [vmem:[#allocation31_spill] sm:$0xff]  ;;  %v6960_v1 = vld [vmem:[#allocation32_spill] sm:$0xff] }
 0x1c8   :  { %v3269_v52 = vcombine.low %v6953_v23, %v2408_v21  ;;  %v6954_v26 = vmov %v6953_v23  ;;  %v2790_v22 = vcombine.high %v6066_v60, %v6159_v19  ;;  %v6218_v59 = vrot.slane %v6955_v33, %v5989_v5 }
 0x1c9   :  { %v3270_v18 = vcombine.high %v6954_v26, %v2408_v21  ;;  %v6956_v10 = vmov %v5921_v42  ;;  %v6226_v21 = vrot.slane %v6958_v6, %v5989_v5  ;;  %v6230_v23 = vrot.slane %v6960_v1, %v5989_v5  ;;  %v6244_v26 = vpop.f32.mrb[116].mxu0 }
 0x1ca   :  { %v6222_v13 = vrot.slane %v6956_v10, %v5989_v5  ;;  %v6233_v30 = vrot.slane %v3133_v38, %v5989_v5  ;;  %v6236_v60 = vrot.slane %v3269_v52, %v5989_v5  ;;  %v6239_v19 = vrot.slane %v2997_v62, %v5989_v5  ;;  %v1722_v33 = vpop.f32.mrb[117].mxu0 }
 0x1cb   :  { %6959 = vst [vmem:[#allocation18_spill] sm:$0xff] %v6226_v21  ;;  %v6242_v29 = vrot.slane %v2998_v20, %v5989_v5  ;;  %v2637_v10 = vcombine.low %v6047_v57, %v6189_v12  ;;  %v2909_v6 = vcombine.low %v6090_v28, %v6195_v56  ;;  %v2638_v38 = vcombine.high %v6047_v57, %v6189_v12  ;;  %v6254_v62 = vpop.f32.mrb[118].mxu0 }
 0x1cc   :  { %6957 = vst [vmem:[#allocation17_spill] sm:$0xff] %v6222_v13  ;;  %v2910_v52 = vcombine.high %v6090_v28, %v6195_v56  ;;  %v2653_v20 = vcombine.low %v6054_v27, %v6192_v11  ;;  %v2925_v1 = vcombine.low %v6094_v49, %v6198_v45  ;;  %v2654_v42 = vcombine.high %v6054_v27, %v6192_v11  ;;  %v6963_v28 = vld [vmem:[#allocation34_spill] sm:$0xff]  ;;  %v6965_v56 = vld [vmem:[#allocation35_spill] sm:$0xff]  ;;  %v6278_v13 = vpop.f32.mrb[119].mxu0  ;;  %v6967_v27 = vld [vmem:[#allocation36_spill] sm:$0xff] }
 0x1cd   :  { %v2926_v14 = vcombine.high %v6094_v49, %v6198_v45  ;;  %v6266_v57 = vrot.slane %v6961_v25, %v5989_v5  ;;  %v6270_v12 = vrot.slane %v6963_v28, %v5989_v5  ;;  %v6274_v43 = vrot.slane %v6965_v56, %v5989_v5  ;;  %v6969_v25 = vld [vmem:[#allocation37_spill] sm:$0xff]  ;;  %v6971_v28 = vld [vmem:[#allocation14_spill] sm:$0xff] }
 0x1ce   :  { %v6282_v49 = vrot.slane %v6967_v27, %v5989_v5  ;;  %v6286_v11 = vrot.slane %v6969_v25, %v5989_v5  ;;  %v6289_v45 = vrot.slane %v3134_v32, %v5989_v5  ;;  %v6295_v56 = vrot.slane %v3270_v18, %v5989_v5 }
 0x1cf   :  { %6962 = vst [vmem:[#allocation19_spill] sm:$0xff] %v6266_v57  ;;  %6964 = vst [vmem:[#allocation20_spill] sm:$0xff] %v6270_v12  ;;  %v6292_v12 = vrot.slane %v2774_v0, %v6971_v28  ;;  %v3062_v21 = vcombine.high %v6113_v37, %v6242_v29  ;;  %v3181_v27 = vcombine.low %v6081_v9, %v6233_v30 }
 0x1d0   :  { %6966 = vst [vmem:[#allocation21_spill] sm:$0xff] %v6274_v43  ;;  %6968 = vst [vmem:[#allocation22_spill] sm:$0xff] %v6282_v49  ;;  %v3182_v43 = vcombine.high %v6081_v9, %v6233_v30  ;;  %v3045_v25 = vcombine.low %v6108_v47, %v6239_v19  ;;  %v3317_v32 = vcombine.low %v6098_v63, %v6236_v60 }
 0x1d1   :  { %6970 = vst [vmem:[#allocation25_spill] sm:$0xff] %v6286_v11  ;;  %v3046_v0 = vcombine.high %v6108_v47, %v6239_v19  ;;  %v3318_v18 = vcombine.high %v6098_v63, %v6236_v60  ;;  %v6972_v49 = vcombine.high %v6070_v4, %v6138_v36  ;;  %v6973_v9 = vcombine.low %v6070_v4, %v6138_v36  ;;  %v4516_v60 = vpop.f32.mrb[120].mxu0 }
 0x1d2   :  { %v6974_v57 = vcombine.low %v6058_v54, %v6130_v8  ;;  %v3061_v63 = vcombine.low %v6113_v37, %v6242_v29  ;;  %v6332_v19 = vrot.slane %v2517_v46, %v6971_v28  ;;  %v6338_v4 = vrot.slane %v2518_v15, %v6971_v28  ;;  %v6344_v8 = vpop.f32.mrb[121].mxu0 }
 0x1d3   :  { %v6315_v11 = vrot.slane %v6972_v49, %v6971_v28  ;;  %v6321_v30 = vrot.slane %v6973_v9, %v6971_v28  ;;  %v6335_v49 = vrot.slane %v2789_v34, %v6971_v28  ;;  %v6341_v36 = vrot.slane %v2790_v22, %v6971_v28  ;;  %v4517_v15 = vpop.f32.mrb[122].mxu0  ;;  %v6978_v9 = vld [vmem:[#allocation11_spill] sm:$0xff] }
 0x1d4   :  { %v6327_v47 = vrot.slane %v6974_v57, %v6971_v28  ;;  %6975 = vst [vmem:[#allocation26_spill] sm:$0xff] %v6338_v4  ;;  %v2184_v54 = vmax.f32 %v6176_v41, %v4516_v60  ;;  %v6347_v57 = vrot.slane %v2637_v10, %v6971_v28  ;;  %v3333_v37 = vcombine.low %v6104_v31, %v6295_v56  ;;  %v6977_v10 = vld [vmem:[#allocation5_spill] sm:$0xff]  ;;  %v1741_v51 = vpop.f32.mrb[123].mxu0 }
 0x1d5   :  { %v3197_v46 = vcombine.low %v6085_v24, %v6289_v45  ;;  %v2182_v34 = vmax.f32 %v6186_v48, %v6344_v8  ;;  %v6356_v22 = vrot.slane %v2909_v6, %v6971_v28  ;;  %v3334_v41 = vcombine.high %v6104_v31, %v6295_v56 }
 0x1d6   :  { %6976 = vst [vmem:[#allocation27_spill] sm:$0xff] %v6347_v57  ;;  %v6979_v60 = vmax.f32 %v6977_v10, %v6978_v9  ;;  %v2185_v53 = vmax.f32 %v1722_v33, %v4517_v15  ;;  %v6366_v4 = vrot.slane %v2638_v38, %v6971_v28  ;;  %v6369_v48 = vrot.slane %v2910_v52, %v6971_v28  ;;  %v6981_v15 = vld [vmem:[#allocation13_spill] sm:$0xff] }
 0x1d7   :  { %v2183_v6 = vmax.f32 %v6152_v61, %v1741_v51  ;;  %v6373_v8 = vrot.slane %v2653_v20, %v6971_v28  ;;  %v6376_v31 = vrot.slane %v2925_v1, %v6971_v28  ;;  %v6379_v56 = vrot.slane %v2654_v42, %v6971_v28  ;;  %v6983_v61 = vld [vmem:[#allocation3_spill] sm:$0xff]  ;;  %v6984_v20 = vld [vmem:[#allocation8_spill] sm:$0xff] }
 0x1d8   :  { %v2296_v57 = vmax.f32 %v2184_v54, %v6979_v60  ;;  %v6980_v54 = vld [vmem:[#allocation2_spill] sm:$0xff]  ;;  %v6386_v52 = vrot.slane %v2926_v14, %v6971_v28  ;;  %v6389_v51 = vrot.slane %v3062_v21, %v6971_v28  ;;  %v6985_v9 = vmax.f32 %v6983_v61, %v6984_v20  ;;  %v6989_v61 = vld [vmem:[#allocation9_spill] sm:$0xff] }
 0x1d9   :  { %v6982_v38 = vmax.f32 %v6980_v54, %v6981_v15  ;;  %v6395_v60 = vrot.slane %v3181_v27, %v6971_v28  ;;  %v6398_v42 = vrot.slane %v3182_v43, %v6971_v28  ;;  %v6405_v54 = vrot.slane %v3317_v32, %v6971_v28  ;;  %v4520_v15 = vpop.f32.mrb[124].mxu0 }
 0x1da   :  { %v2356_v33 = vadd.f32 %v5724_v2, %v2296_v57  ;;  %v2295_v1 = vmax.f32 %v2183_v6, %v6985_v9  ;;  %v6401_v57 = vrot.slane %v3045_v25, %v6971_v28  ;;  %v6408_v21 = vrot.slane %v3046_v0, %v6971_v28  ;;  %v1754_v9 = vpop.f32.mrb[125].mxu0 }
 0x1db   :  { %v2297_v10 = vmax.f32 %v2185_v53, %v6982_v38  ;;  %v6412_v27 = vrot.slane %v3318_v18, %v6971_v28  ;;  %v6415_v43 = vrot.slane %v3061_v63, %v6971_v28  ;;  %v6418_v25 = vrot.slane %v3333_v37, %v6971_v28  ;;  %v4521_v29 = vpop.f32.mrb[126].mxu0 }
 0x1dc   :  { %v2412_v53 = vmax.f32 %v2356_v33, 0.0  ;;  %v2355_v6 = vadd.f32 %v5724_v2, %v2295_v1  ;;  %v6987_v33 = vmax.f32 %v6017_v3, 0.0  ;;  %v2237_v20 = vmax.f32 %v4520_v15, %v6989_v61 }
 0x1dd   :  { %v2357_v14 = vadd.f32 %v5724_v2, %v2297_v10  ;;  %6986 = vst [vmem:[#allocation28_spill] sm:$0xff] %v6418_v25  ;;  %v2186_v18 = vmax.f32 %v6278_v13, %v1754_v9  ;;  %v6427_v63 = vrot.slane %v3197_v46, %v6971_v28  ;;  %v6430_v37 = vrot.slane %v3334_v41, %v6971_v28  ;;  %v1757_v13 = vpop.f32.mrb[127].mxu0  ;;  %v6997_v9 = vld [vmem:[#allocation4_spill] sm:$0xff] }
 0x1de   :  { %v2877_v38 = vcombine.low %v2412_v53, %v6987_v33  ;;  %v6988_v32 = vmov %v6987_v33  ;;  %v2411_v1 = vmax.f32 %v2355_v6, 0.0  ;;  %v6994_v33 = vmax.f32 %v6004_v16, 0.0 }
 0x1df   :  { %v2878_v10 = vcombine.high %v2412_v53, %v6988_v32  ;;  %v2413_v0 = vmax.f32 %v2357_v14, 0.0  ;;  %6990 = vst [vmem:[#allocation29_spill] sm:$0xff] %v6427_v63  ;;  %6991 = vst [vmem:[#allocation30_spill] sm:$0xff] %v6430_v37  ;;  %v6992_v53 = vmax.f32 %v6030_v44, 0.0 }
 0x1e0   :  { %v6433_v25 = vrot.slane %v2877_v38, %v5989_v5  ;;  %v2741_v46 = vcombine.low %v2411_v1, %v6994_v33  ;;  %v6995_v32 = vmov %v6994_v33  ;;  %v6996_v38 = vmax.f32 %v6166_v35, %v6254_v62 }
 0x1e1   :  { %v6436_v3 = vrot.slane %v2878_v10, %v5989_v5  ;;  %v3013_v14 = vcombine.low %v2413_v0, %v6992_v53  ;;  %v6993_v6 = vmov %v6992_v53  ;;  %v2742_v41 = vcombine.high %v2411_v1, %v6995_v32  ;;  %v6998_v10 = vld [vmem:[#allocation10_spill] sm:$0xff] }
 0x1e2   :  { %v3014_v15 = vcombine.high %v2413_v0, %v6993_v6  ;;  %v2293_v61 = vmax.f32 %v6996_v38, %v2237_v20  ;;  %v6999_v37 = vmax.f32 %v6997_v9, %v6998_v10  ;;  %v7000_v0 = vld [vmem:[#allocation6_spill] sm:$0xff]  ;;  %v2187_v33 = vmax.f32 %v6244_v26, %v1757_v13 }
 0x1e3   :  { %v6453_v53 = vrot.slane %v3013_v14, %v5989_v5  ;;  %v2238_v6 = vmax.f32 %v4521_v29, %v7000_v0  ;;  %v2749_v16 = vrot.slane %v2741_v46, %v5989_v5  ;;  %v2756_v1 = vrot.slane %v2742_v41, %v5989_v5 }
 0x1e4   :  { %v2298_v63 = vmax.f32 %v2186_v18, %v6999_v37  ;;  %v6456_v44 = vrot.slane %v3014_v15, %v5989_v5  ;;  %v2353_v35 = vadd.f32 %v5724_v2, %v2293_v61  ;;  %v7001_v18 = vld [vmem:[#allocation7_spill] sm:$0xff]  ;;  %v7002_v37 = vld [vmem:[#allocation12_spill] sm:$0xff]  ;;  %v2941_v15 = vcombine.low %v6433_v25, %v6230_v23 }
 0x1e5   :  { %v2294_v20 = vmax.f32 %v2182_v34, %v2238_v6  ;;  %v7003_v14 = vmax.f32 %v7001_v18, %v7002_v37  ;;  %v2942_v29 = vcombine.high %v6433_v25, %v6230_v23  ;;  %v2806_v46 = vcombine.high %v2749_v16, %v6135_v58  ;;  %v7016_v23 = vld [vmem:[#allocation27_spill] sm:$0xff] }
 0x1e6   :  { %v2358_v62 = vadd.f32 %v5724_v2, %v2298_v63  ;;  %v2409_v26 = vmax.f32 %v2353_v35, 0.0  ;;  %v2805_v41 = vcombine.low %v2749_v16, %v6135_v58  ;;  %v2821_v63 = vcombine.low %v2756_v1, %v6180_v39 }
 0x1e7   :  { %v2299_v32 = vmax.f32 %v2187_v33, %v7003_v14  ;;  %v2354_v38 = vadd.f32 %v5724_v2, %v2294_v20  ;;  %v2822_v61 = vcombine.high %v2756_v1, %v6180_v39  ;;  %v7004_v9 = vmax.f32 %v6008_v50, 0.0 }
 0x1e8   :  { %v2414_v13 = vmax.f32 %v2358_v62, 0.0  ;;  %v7006_v33 = vmax.f32 %v6013_v7, 0.0  ;;  %v6487_v18 = vrot.slane %v2805_v41, %v6971_v28  ;;  %v7008_v7 = vmax.f32 %v6000_v17, 0.0 }
 0x1e9   :  { %v2359_v34 = vadd.f32 %v5724_v2, %v2299_v32  ;;  %v2469_v10 = vcombine.low %v2409_v26, %v7004_v9  ;;  %v7005_v0 = vmov %v7004_v9  ;;  %v2410_v16 = vmax.f32 %v2354_v38, 0.0 }
 0x1ea   :  { %v2470_v6 = vcombine.high %v2409_v26, %v7005_v0  ;;  %v3149_v35 = vcombine.low %v2414_v13, %v7006_v33  ;;  %v7007_v62 = vmov %v7006_v33  ;;  %v2820_v2 = vrot.slane %v2806_v46, %v6971_v28 }
 0x1eb   :  { %v3150_v58 = vcombine.high %v2414_v13, %v7007_v62  ;;  %v2415_v20 = vmax.f32 %v2359_v34, 0.0  ;;  %v2477_v39 = vrot.slane %v2469_v10, %v5989_v5  ;;  %v2605_v14 = vcombine.low %v2410_v16, %v7008_v7 }
 0x1ec   :  { %v2484_v1 = vrot.slane %v2470_v6, %v5989_v5  ;;  %v6492_v50 = vrot.slane %v3149_v35, %v5989_v5  ;;  %v7009_v32 = vmov %v7008_v7  ;;  %v7010_v13 = vmax.f32 %v6026_v40, 0.0 }
 0x1ed   :  { %v6495_v37 = vrot.slane %v3150_v58, %v5989_v5  ;;  %v2606_v26 = vcombine.high %v2410_v16, %v7009_v32  ;;  %v2534_v34 = vcombine.high %v2477_v39, %v6184_v55  ;;  %v2840_v9 = vcombine.high %v6292_v12, %v2820_v2 }
 0x1ee   :  { %v3285_v46 = vcombine.low %v2415_v20, %v7010_v13  ;;  %v7011_v41 = vmov %v7010_v13  ;;  %v2533_v10 = vcombine.low %v2477_v39, %v6184_v55  ;;  %v2837_v0 = vcombine.low %v6327_v47, %v6487_v18 }
 0x1ef   :  { %v3286_v38 = vcombine.high %v2415_v20, %v7011_v41  ;;  %v2613_v6 = vrot.slane %v2605_v14, %v5989_v5  ;;  %v6512_v17 = vrot.slane %v2606_v26, %v5989_v5  ;;  %v2548_v35 = vrot.slane %v2534_v34, %v6971_v28 }
 0x1f0   :  { %v6515_v33 = vrot.slane %v3285_v46, %v5989_v5  ;;  %v6522_v62 = vrot.slane %v2533_v10, %v6971_v28  ;;  %v2838_v55 = vcombine.high %v6327_v47, %v6487_v18  ;;  %v2549_v58 = vcombine.low %v2484_v1, %v6218_v59 }
 0x1f1   :  { %v6518_v40 = vrot.slane %v3286_v38, %v5989_v5  ;;  %v2829_v16 = vrot.slane %v2821_v63, %v6971_v28  ;;  %v2839_v20 = vcombine.low %v6292_v12, %v2820_v2  ;;  %v2550_v39 = vcombine.high %v2484_v1, %v6218_v59  ;;  %v4884_v2 = vld [vmem:[%s6837_s1 + $0x50] sm:$0xff]  }
 0x1f2   :  { %v2836_v7 = vrot.slane %v2822_v61, %v6971_v28  ;;  %v2568_v5 = vcombine.high %v6315_v11, %v2548_v35  ;;  %v2566_v14 = vcombine.high %v6321_v30, %v6522_v62  ;;  %v2565_v32 = vcombine.low %v6321_v30, %v6522_v62  ;;  %v4883_v61 = vld [vmem:[%s6837_s1 + $0x90] sm:$0xff]  }
 0x1f3   :  { %v2557_v26 = vrot.slane %v2549_v58, %v6971_v28  ;;  %v2841_v13 = vcombine.low %v6335_v49, %v2829_v16  ;;  %v2567_v63 = vcombine.low %v6315_v11, %v2548_v35  ;;  %v2564_v12 = vrot.slane %v2550_v39, %v6971_v28  ;;  %v7012_v11 = vld [vmem:[#allocation26_spill] sm:$0xff]  ;;  %4377 = vmatprep.subr.bf16.mxu1 %v4883_v61  ;;  %v7013_v39 = vld [vmem:[#allocation15_spill] sm:$0xff] }
 0x1f4   :  { %v2843_v59 = vcombine.low %v6341_v36, %v2836_v7  ;;  %v4664_v1 = vpack.i.bf16 %v2568_v5, %v2840_v9  ;;  %v4654_v46 = vpack.i.bf16 %v2566_v14, %v2838_v55  ;;  %v2842_v35 = vcombine.high %v6335_v49, %v2829_v16  ;;  %4378 = vmatpush3.bf16.msra.mxu1 %v4884_v2 }
 0x1f5   :  { %v2569_v41 = vcombine.low %v6332_v19, %v2557_v26  ;;  %v2570_v38 = vcombine.high %v6332_v19, %v2557_v26  ;;  %v4659_v34 = vpack.i.bf16 %v2567_v63, %v2839_v20  ;;  %v2571_v10 = vcombine.low %v7012_v11, %v2564_v12 }
 0x1f6   :  { %v2572_v58 = vcombine.high %v7012_v11, %v2564_v12  ;;  %4665 = vrot.lane.b32.xlu1 %v4664_v1, %s4901_s4  ;;  %4655 = vrot.lane.b32.xlu0 %v4654_v46, %s4902_s5  ;;  %v2844_v55 = vcombine.high %v6341_v36, %v2836_v7  ;;  %v2669_v5 = vcombine.low %v2613_v6, %v7013_v39  ;;  %v7014_v7 = vld [vmem:[#allocation16_spill] sm:$0xff] }
 0x1f7   :  { %v4669_v9 = vpack.i.bf16 %v2569_v41, %v2841_v13  ;;  %v4679_v19 = vpack.i.bf16 %v2571_v10, %v2843_v59  ;;  %v4674_v20 = vpack.i.bf16 %v2570_v38, %v2842_v35  ;;  %v2949_v49 = vrot.slane %v2941_v15, %v6971_v28  ;;  %v7015_v59 = vld [vmem:[#allocation19_spill] sm:$0xff] }
 0x1f8   :  { %v2670_v16 = vcombine.high %v2613_v6, %v7013_v39  ;;  %v4684_v14 = vpack.i.bf16 %v2572_v58, %v2844_v55  ;;  %v2677_v26 = vrot.slane %v2669_v5, %v6971_v28  ;;  %v2956_v36 = vrot.slane %v2942_v29, %v6971_v28  ;;  %v7017_v39 = vld [vmem:[#allocation25_spill] sm:$0xff] }
 0x1f9   :  { %v2685_v13 = vcombine.low %v6512_v17, %v7014_v7  ;;  %v2973_v63 = vcombine.low %v6356_v22, %v2949_v49  ;;  %v2974_v12 = vcombine.high %v6356_v22, %v2949_v49  ;;  %v2957_v6 = vcombine.low %v6436_v3, %v7015_v59  ;;  %v7018_v49 = vld [vmem:[#allocation17_spill] sm:$0xff] }
 0x1fa   :  { %v2684_v15 = vrot.slane %v2670_v16, %v6971_v28  ;;  %4670 = vrot.lane.b32.xlu1 %v4669_v9, %s4903_s6  ;;  %4660 = vrot.lane.b32.xlu0 %v4659_v34, %s4904_s7  ;;  %v2701_v25 = vcombine.low %v7016_v23, %v2677_v26  ;;  %v2702_v29 = vcombine.high %v7016_v23, %v2677_v26 }
 0x1fb   :  { %v2975_v61 = vcombine.low %v6369_v48, %v2956_v36  ;;  %v2976_v1 = vcombine.high %v6369_v48, %v2956_v36  ;;  %v2693_v46 = vrot.slane %v2685_v13, %v6971_v28  ;;  %v2965_v11 = vrot.slane %v2957_v6, %v6971_v28 }
 0x1fc   :  { %v2703_v2 = vcombine.low %v6366_v4, %v2684_v15  ;;  %v2704_v22 = vcombine.high %v6366_v4, %v2684_v15  ;;  %v4689_v41 = vpack.i.bf16 %v2701_v25, %v2973_v63  ;;  %v4694_v38 = vpack.i.bf16 %v2702_v29, %v2974_v12  ;;  %v7020_v63 = vld [vmem:[#allocation20_spill] sm:$0xff] }
 0x1fd   :  { %v2686_v34 = vcombine.high %v6512_v17, %v7014_v7  ;;  %v2705_v58 = vcombine.low %v6373_v8, %v2693_v46  ;;  %v2706_v9 = vcombine.high %v6373_v8, %v2693_v46  ;;  %v2977_v4 = vcombine.low %v6376_v31, %v2965_v11 }
 0x1fe   :  { %v4699_v10 = vpack.i.bf16 %v2703_v2, %v2975_v61  ;;  %v4704_v35 = vpack.i.bf16 %v2704_v22, %v2976_v1  ;;  %4680 = vrot.lane.b32.xlu1 %v4679_v19, %s4905_s8  ;;  %4675 = vrot.lane.b32.xlu0 %v4674_v20, %s4906_s9  ;;  %v2978_v48 = vcombine.high %v6376_v31, %v2965_v11 }
 0x1ff   :  { %v2700_v55 = vrot.slane %v2686_v34, %v6971_v28  ;;  %v2958_v17 = vcombine.high %v6436_v3, %v7015_v59  ;;  %v3094_v5 = vcombine.high %v6456_v44, %v7017_v39  ;;  %v3213_v8 = vcombine.low %v6492_v50, %v7018_v49 }
 0x200   :  { %v3214_v19 = vcombine.high %v6492_v50, %v7018_v49  ;;  %v4709_v16 = vpack.i.bf16 %v2705_v58, %v2977_v4  ;;  %v6600_v20 = vpack.i.bf16 %v2706_v9, %v2978_v48  ;;  %v7019_v50 = vld [vmem:[#allocation22_spill] sm:$0xff]  ;;  %v3349_v12 = vcombine.low %v6515_v33, %v7020_v63  ;;  %v7021_v9 = vld [vmem:[#allocation21_spill] sm:$0xff] }
 0x201   :  { %v2707_v26 = vcombine.low %v6379_v56, %v2700_v55  ;;  %v2708_v31 = vcombine.high %v6379_v56, %v2700_v55  ;;  %v2972_v36 = vrot.slane %v2958_v17, %v6971_v28  ;;  %v6606_v3 = vrot.slane %v3094_v5, %v6971_v28  ;;  %v7022_v48 = vld [vmem:[#allocation18_spill] sm:$0xff] }
 0x202   :  { %v6609_v7 = vrot.slane %v3213_v8, %v6971_v28  ;;  %v6612_v13 = vrot.slane %v3214_v19, %v6971_v28  ;;  %4685 = vrot.lane.b32.xlu0 %v4684_v14, %s4907_s10  ;;  %4690 = vrot.lane.b32.xlu1 %v4689_v41, %s4908_s11  ;;  %v3077_v56 = vcombine.low %v6453_v53, %v7019_v50 }
 0x203   :  { %v3078_v15 = vcombine.high %v6453_v53, %v7019_v50  ;;  %v2979_v59 = vcombine.low %v6386_v52, %v2972_v36  ;;  %v2980_v6 = vcombine.high %v6386_v52, %v2972_v36  ;;  %v3116_v23 = vcombine.high %v6389_v51, %v6606_v3  ;;  %v7024_v36 = vld [vmem:[#allocation28_spill] sm:$0xff] }
 0x204   :  { %v3115_v14 = vcombine.low %v6389_v51, %v6606_v3  ;;  %v3246_v25 = vcombine.high %v6395_v60, %v6609_v7  ;;  %v3245_v29 = vcombine.low %v6395_v60, %v6609_v7  ;;  %v3248_v61 = vcombine.high %v6398_v42, %v6612_v13 }
 0x205   :  { %v3247_v53 = vcombine.low %v6398_v42, %v6612_v13  ;;  %v4719_v2 = vpack.i.bf16 %v2707_v26, %v2979_v59  ;;  %v4724_v52 = vpack.i.bf16 %v2708_v31, %v2980_v6  ;;  %v6637_v22 = vrot.slane %v3077_v56, %v6971_v28  ;;  %v7025_v13 = vld [vmem:[#allocation29_spill] sm:$0xff]  ;;  %v7026_v56 = vld [vmem:[#allocation30_spill] sm:$0xff] }
 0x206   :  { %v6640_v1 = vrot.slane %v3349_v12, %v6971_v28  ;;  %4695 = vrot.lane.b32.xlu0 %v4694_v38, %s4909_s12  ;;  %4700 = vrot.lane.b32.xlu1 %v4699_v10, %s4910_s13  ;;  %v3092_v51 = vrot.slane %v3078_v15, %v6971_v28  ;;  %v3350_v60 = vcombine.high %v6515_v33, %v7020_v63  ;;  %v4916_v6 = vmov 0  }
 0x207   :  { %v3093_v42 = vcombine.low %v6456_v44, %v7017_v39  ;;  %v3109_v46 = vcombine.low %v6401_v57, %v6637_v22  ;;  %v3110_v41 = vcombine.high %v6401_v57, %v6637_v22  ;;  %v3365_v4 = vcombine.low %v6518_v40, %v7021_v9  ;;  %3883 = vmatprep.subr.bf16.mxu1 %v4916_v6 }
 0x208   :  { %v3382_v38 = vcombine.high %v6405_v54, %v6640_v1  ;;  %v3381_v11 = vcombine.low %v6405_v54, %v6640_v1  ;;  %v3111_v34 = vcombine.low %v6408_v21, %v3092_v51  ;;  %v3364_v10 = vrot.slane %v3350_v60, %v6971_v28 }
 0x209   :  { %v3112_v33 = vcombine.high %v6408_v21, %v3092_v51  ;;  %v3101_v44 = vrot.slane %v3093_v42, %v6971_v28  ;;  %v3229_v55 = vcombine.low %v6495_v37, %v7022_v48  ;;  %v3366_v17 = vcombine.high %v6518_v40, %v7021_v9 }
 0x20a   :  { %v4729_v58 = vpack.i.bf16 %v3382_v38, %v3110_v41  ;;  %4705 = vrot.lane.b32.xlu0 %v4704_v35, %s4911_s14  ;;  %4710 = vrot.lane.b32.xlu1 %v4709_v16, %s4912_s15  ;;  %v3383_v21 = vcombine.low %v6412_v27, %v3364_v10  ;;  %v3384_v39 = vcombine.high %v6412_v27, %v3364_v10 }
 0x20b   :  { %v3113_v5 = vcombine.low %v6415_v43, %v3101_v44  ;;  %v3373_v49 = vrot.slane %v3365_v4, %v6971_v28  ;;  %v3114_v8 = vcombine.high %v6415_v43, %v3101_v44  ;;  %v3237_v19 = vrot.slane %v3229_v55, %v6971_v28 }
 0x20c   :  { %v3380_v40 = vrot.slane %v3366_v17, %v6971_v28  ;;  %v4734_v26 = vpack.i.bf16 %v3383_v21, %v3111_v34  ;;  %v4739_v31 = vpack.i.bf16 %v3384_v39, %v3112_v33  ;;  %v7023_v35 = vcombine.high %v6085_v24, %v6289_v45 }
 0x20d   :  { %v3230_v27 = vcombine.high %v6495_v37, %v7022_v48  ;;  %v3385_v3 = vcombine.low %v7024_v36, %v3373_v49  ;;  %v3386_v7 = vcombine.high %v7024_v36, %v3373_v49  ;;  %v3249_v43 = vcombine.low %v7025_v13, %v3237_v19 }
 0x20e   :  { %v3212_v16 = vrot.slane %v7023_v35, %v6971_v28  ;;  %v3250_v50 = vcombine.high %v7025_v13, %v3237_v19  ;;  %4715 = vrot.lane.b32.xlu0 %v6600_v20, %s4913_s16  ;;  %4720 = vrot.lane.b32.xlu1 %v4719_v2, %s4914_s17  ;;  %v3387_v63 = vcombine.low %v7026_v56, %v3380_v40 }
 0x20f   :  { %v3244_v24 = vrot.slane %v3230_v27, %v6971_v28  ;;  %v3388_v45 = vcombine.high %v7026_v56, %v3380_v40  ;;  %v4744_v37 = vpack.i.bf16 %v3385_v3, %v3113_v5  ;;  %v4749_v12 = vpack.i.bf16 %v3386_v7, %v3114_v8 }
 0x211   :  { %v3251_v15 = vcombine.low %v3212_v16, %v3244_v24  ;;  %v3252_v59 = vcombine.high %v3212_v16, %v3244_v24 }
 0x212   :  { %4725 = vrot.lane.b32.xlu0 %v4724_v52, %s4915_s18  ;;  %3534 = vrot.lane.b32.xlu1 %v3116_v23, %s4907_s10 }
 0x216   :  { %3530 = vrot.lane.b32.xlu0 %v3115_v14, %s4905_s8  ;;  %3542 = vrot.lane.b32.xlu1 %v3246_v25, %s4909_s12 }
 0x21a   :  { %3538 = vrot.lane.b32.xlu0 %v3245_v29, %s4908_s11  ;;  %3550 = vrot.lane.b32.xlu1 %v3248_v61, %s4911_s14 }
 0x21e   :  { %3546 = vrot.lane.b32.xlu0 %v3247_v53, %s4910_s13  ;;  %4730 = vrot.lane.b32.xlu1 %v4729_v58, %s4902_s5 }
 0x222   :  { %4735 = vrot.lane.b32.xlu0 %v4734_v26, %s4904_s7  ;;  %4740 = vrot.lane.b32.xlu1 %v4739_v31, %s4901_s4 }
 0x226   :  { %4745 = vrot.lane.b32.xlu0 %v4744_v37, %s4903_s6  ;;  %4750 = vrot.lane.b32.xlu1 %v4749_v12, %s4906_s9 }
 0x22a   :  { %3554 = vrot.lane.b32.xlu0 %v3249_v43, %s4912_s15  ;;  %3558 = vrot.lane.b32.xlu1 %v3250_v50, %s4913_s16 }
 0x22e   :  { %3590 = vrot.lane.b32.xlu0 %v3387_v63, %s4905_s8  ;;  %3562 = vrot.lane.b32.xlu1 %v3251_v15, %s4914_s17 }
 0x232   :  { %3594 = vrot.lane.b32.xlu0 %v3388_v45, %s4907_s10  ;;  %3566 = vrot.lane.b32.xlu1 %v3252_v59, %s4915_s18 }
 0x268   :  { %v4666_v28 = vpop.permute.xlu1 %4665  ;;  %v4656_v20 = vpop.permute.xlu0 %4655 }
 0x269   :  { %v4658_v23 = vunpack.i.h.bf16 %v4656_v20  ;;  %v4657_v14 = vunpack.i.l.bf16 %v4656_v20  ;;  %v4668_v2 = vunpack.i.h.bf16 %v4666_v28  ;;  %v4667_v52 = vunpack.i.l.bf16 %v4666_v28 }
 0x26b   :  { %v3598_v51 = vsel %vm3597_vm2, %v2565_v32, %v4658_v23  ;;  %v3627_v60 = vsel %vm3597_vm2, %v2837_v0, %v4657_v14 }
 0x26c   :  { %v4671_v25 = vpop.permute.xlu1 %4670  ;;  %v4661_v29 = vpop.permute.xlu0 %4660 }
 0x26d   :  { %v4663_v61 = vunpack.i.h.bf16 %v4661_v29  ;;  %v4662_v53 = vunpack.i.l.bf16 %v4661_v29  ;;  %v4673_v38 = vunpack.i.h.bf16 %v4671_v25  ;;  %v4672_v34 = vunpack.i.l.bf16 %v4671_v25 }
 0x26f   :  { %v3600_v42 = vsel %vm3599_vm3, %v3598_v51, %v4663_v61  ;;  %v3628_v41 = vsel %vm3599_vm3, %v3627_v60, %v4662_v53 }
 0x270   :  { %v3602_v10 = vsel %vm3601_vm4, %v3600_v42, %v4668_v2  ;;  %v3629_v33 = vsel %vm3601_vm4, %v3628_v41, %v4667_v52  ;;  %v4681_v30 = vpop.permute.xlu1 %4680  ;;  %v4676_v62 = vpop.permute.xlu0 %4675 }
 0x271   :  { %v4678_v32 = vunpack.i.h.bf16 %v4676_v62  ;;  %v4677_v44 = vunpack.i.l.bf16 %v4676_v62  ;;  %v4683_v58 = vunpack.i.h.bf16 %v4681_v30  ;;  %v4682_v47 = vunpack.i.l.bf16 %v4681_v30 }
 0x272   :  { %v3604_v18 = vsel %vm3603_vm5, %v3602_v10, %v4673_v38  ;;  %v3630_v0 = vsel %vm3603_vm5, %v3629_v33, %v4672_v34 }
 0x273   :  { %v3606_v9 = vsel %vm3605_vm6, %v3604_v18, %v4678_v32  ;;  %v3631_v4 = vsel %vm3605_vm6, %v3630_v0, %v4677_v44 }
 0x274   :  { %v4686_v48 = vpop.permute.xlu0 %4685  ;;  %v4691_v55 = vpop.permute.xlu1 %4690  ;;  %v3608_v39 = vsel %vm3607_vm7, %v3606_v9, %v4683_v58  ;;  %v3632_v5 = vsel %vm3607_vm7, %v3631_v4, %v4682_v47  ;;  %v4885_v47 = vld [vmem:[%s6837_s1 + $0x98] sm:$0xff]   ;;  %v4886_v9 = vld [vmem:[%s6837_s1 + $0xa0] sm:$0xff]  }
 0x275   :  { %v4688_v17 = vunpack.i.h.bf16 %v4686_v48  ;;  %v4687_v21 = vunpack.i.l.bf16 %v4686_v48  ;;  %v4693_v49 = vunpack.i.h.bf16 %v4691_v55  ;;  %v4692_v8 = vunpack.i.l.bf16 %v4691_v55  ;;  %v4887_v55 = vld [vmem:[%s6837_s1 + $0xa8] sm:$0xff]  }
 0x277   :  { %v3610_v19 = vsel %vm3609_vm8, %v3608_v39, %v4688_v17  ;;  %v3633_v40 = vsel %vm3609_vm8, %v3632_v5, %v4687_v21  ;;  %v4888_v5 = vld [vmem:[%s6837_s1 + $0xb0] sm:$0xff]  }
 0x278   :  { %v4696_v26 = vpop.permute.xlu0 %4695  ;;  %v4701_v31 = vpop.permute.xlu1 %4700  ;;  %v3612_v27 = vsel %vm3611_vm9, %v3610_v19, %v4693_v49  ;;  %v3634_v36 = vsel %vm3611_vm9, %v3633_v40, %v4692_v8 }
 0x279   :  { %v4698_v35 = vunpack.i.h.bf16 %v4696_v26  ;;  %v4697_v16 = vunpack.i.l.bf16 %v4696_v26  ;;  %v4703_v3 = vunpack.i.h.bf16 %v4701_v31  ;;  %v4702_v7 = vunpack.i.l.bf16 %v4701_v31 }
 0x27b   :  { %v3614_v13 = vsel %vm3613_vm10, %v3612_v27, %v4698_v35  ;;  %v3635_v43 = vsel %vm3613_vm10, %v3634_v36, %v4697_v16  ;;  %v4889_v27 = vld [vmem:[%s6837_s1 + $0xb8] sm:$0xff]  }
 0x27c   :  { %v4706_v50 = vpop.permute.xlu0 %4705  ;;  %v4711_v56 = vpop.permute.xlu1 %4710  ;;  %v3616_v45 = vsel %vm3615_vm11, %v3614_v13, %v4703_v3  ;;  %v3636_v37 = vsel %vm3615_vm11, %v3635_v43, %v4702_v7 }
 0x27d   :  { %v4708_v63 = vunpack.i.h.bf16 %v4706_v50  ;;  %v4707_v24 = vunpack.i.l.bf16 %v4706_v50  ;;  %v4713_v12 = vunpack.i.h.bf16 %v4711_v56  ;;  %v4712_v15 = vunpack.i.l.bf16 %v4711_v56 }
 0x27f   :  { %v3618_v59 = vsel %vm3617_vm12, %v3616_v45, %v4708_v63  ;;  %v3637_v28 = vsel %vm3617_vm12, %v3636_v37, %v4707_v24  ;;  %v4890_v63 = vld [vmem:[%s6837_s1 + $0xc0] sm:$0xff]  }
 0x280   :  { %v4716_v20 = vpop.permute.xlu0 %4715  ;;  %v4721_v23 = vpop.permute.xlu1 %4720  ;;  %v3620_v29 = vsel %vm3619_vm13, %v3618_v59, %v4713_v12  ;;  %v3638_v61 = vsel %vm3619_vm13, %v3637_v28, %v4712_v15  ;;  %v4891_v12 = vld [vmem:[%s6837_s1 + $0xc8] sm:$0xff]  }
 0x281   :  { %v4718_v14 = vunpack.i.h.bf16 %v4716_v20  ;;  %v4717_v25 = vunpack.i.l.bf16 %v4716_v20  ;;  %v4723_v53 = vunpack.i.h.bf16 %v4721_v23  ;;  %v4722_v2 = vunpack.i.l.bf16 %v4721_v23 }
 0x283   :  { %v3622_v52 = vsel %vm3621_vm14, %v3620_v29, %v4718_v14  ;;  %v3639_v51 = vsel %vm3621_vm14, %v3638_v61, %v4717_v25  ;;  %v4892_v14 = vld [vmem:[%s6837_s1 + $0xd0] sm:$0xff]  }
 0x284   :  { %v4726_v60 = vpop.permute.xlu0 %4725  ;;  %v3535_v42 = vpop.permute.xlu1 %3534  ;;  %v3624_v34 = vsel %vm3623_vm15, %v3622_v52, %v4723_v53  ;;  %v3640_v10 = vsel %vm3623_vm15, %v3639_v51, %v4722_v2  ;;  %v4893_v2 = vld [vmem:[%s6837_s1 + $0xd8] sm:$0xff]   ;;  %v4894_v51 = vld [vmem:[%s6837_s1 + $0xe0] sm:$0xff]  }
 0x285   :  { %v4728_v41 = vunpack.i.h.bf16 %v4726_v60  ;;  %v4727_v38 = vunpack.i.l.bf16 %v4726_v60 }
 0x287   :  { %v3626_v33 = vsel %vm3625_vm0, %v3624_v34, %v4728_v41  ;;  %v3641_v30 = vsel %vm3625_vm0, %v3640_v10, %v4727_v38  ;;  %v4895_v38 = vld [vmem:[%s6837_s1 + $0xe8] sm:$0xff]  }
 0x288   :  { %v3664_v62 = vpack.c.bf16 %v3626_v33, %v3626_v33  ;;  %v3531_v32 = vpop.permute.xlu0 %3530  ;;  %v3543_v44 = vpop.permute.xlu1 %3542  ;;  %v3665_v58 = vpack.c.bf16 %v3641_v30, %v3641_v30  ;;  %v4896_v33 = vld [vmem:[%s6837_s1 + $0xf0] sm:$0xff]  }
 0x28a   :  { %3875 = vmatprep.mubr.bf16.mxu1 %v3665_v58  ;;  %v4898_v58 = vld [vmem:[%s6839_s2 + $0x8] sm:$0xff]  }
 0x28b   :  { %3876 = vmatmul.mubr.bf16.vlgmr.msra.gmra.mrb[96].mxu1 %v3664_v62 }
 0x28c   :  { %3884 = vmatpush1.bf16.msra.mxu1 %v4885_v47  ;;  %v3539_v18 = vpop.permute.xlu0 %3538  ;;  %v6744_v0 = vpop.permute.xlu1 %3550 }
 0x28d   :  { %3885 = vmatprep.subr.bf16.mxu1 %v4916_v6 }
 0x290   :  { %3886 = vmatpush1.bf16.msra.mxu1 %v4886_v9  ;;  %v3547_v4 = vpop.permute.xlu0 %3546  ;;  %v4731_v48 = vpop.permute.xlu1 %4730 }
 0x291   :  { %3887 = vmatprep.subr.bf16.mxu1 %v4916_v6  ;;  %v4732_v17 = vunpack.i.l.bf16 %v4731_v48  ;;  %v4733_v40 = vunpack.i.h.bf16 %v4731_v48 }
 0x293   :  { %v3642_v8 = vsel %vm3597_vm2, %v3109_v46, %v4732_v17  ;;  %v3657_v22 = vsel %vm3597_vm2, %v3381_v11, %v4733_v40 }
 0x294   :  { %3888 = vmatpush1.bf16.msra.mxu1 %v4887_v55  ;;  %v4736_v21 = vpop.permute.xlu0 %4735  ;;  %v4741_v39 = vpop.permute.xlu1 %4740  ;;  %v7028_v55 = vld [vmem:[#allocation24_spill] sm:$0xff] }
 0x295   :  { %v4737_v49 = vunpack.i.l.bf16 %v4736_v21  ;;  %3889 = vmatprep.subr.bf16.mxu1 %v4916_v6  ;;  %v4742_v19 = vunpack.i.l.bf16 %v4741_v39  ;;  %v4738_v31 = vunpack.i.h.bf16 %v4736_v21  ;;  %v4743_v46 = vunpack.i.h.bf16 %v4741_v39 }
 0x296   :  { %v7029_v17 = vunpack.c.l.bf16 %v7028_v55 }
 0x297   :  { %v3643_v26 = vsel %vm3599_vm3, %v3642_v8, %v4737_v49  ;;  %v3658_v13 = vsel %vm3599_vm3, %v3657_v22, %v4738_v31 }
 0x298   :  { %3890 = vmatpush1.bf16.msra.mxu1 %v4888_v5  ;;  %v4746_v35 = vpop.permute.xlu0 %4745  ;;  %v4751_v16 = vpop.permute.xlu1 %4750  ;;  %v3644_v57 = vsel %vm3601_vm4, %v3643_v26, %v4742_v19  ;;  %v3659_v1 = vsel %vm3601_vm4, %v3658_v13, %v4743_v46 }
 0x299   :  { %v4747_v36 = vunpack.i.l.bf16 %v4746_v35  ;;  %v4752_v3 = vunpack.i.l.bf16 %v4751_v16  ;;  %3891 = vmatprep.subr.bf16.mxu1 %v4916_v6  ;;  %v4748_v43 = vunpack.i.h.bf16 %v4746_v35  ;;  %v4753_v11 = vunpack.i.h.bf16 %v4751_v16  ;;  %v82_v35 = vld [vmem:[%s6839_s2 + $0x10] sm:$0x1] }
 0x29a   :  { %v83_v16 = vunpack.c.l.bf16 %v82_v35 }
 0x29b   :  { %v3645_v7 = vsel %vm3603_vm5, %v3644_v57, %v4747_v36  ;;  %v3660_v37 = vsel %vm3603_vm5, %v3659_v1, %v4748_v43 }
 0x29c   :  { %v3646_v50 = vsel %vm3605_vm6, %v3645_v7, %v4752_v3  ;;  %3892 = vmatpush1.bf16.msra.mxu1 %v4889_v27  ;;  %v3555_v56 = vpop.permute.xlu0 %3554  ;;  %v3661_v59 = vsel %vm3605_vm6, %v3660_v37, %v4753_v11  ;;  %v3559_v53 = vpop.permute.xlu1 %3558 }
 0x29d   :  { %v3647_v24 = vsel %vm3607_vm7, %v3646_v50, %v3531_v32  ;;  %3893 = vmatprep.subr.bf16.mxu1 %v4916_v6  ;;  %v4917_v32 = vmov 0.0  }
 0x29e   :  { %v3648_v54 = vsel %vm3609_vm8, %v3647_v24, %v3535_v42 }
 0x29f   :  { %v3649_v15 = vsel %vm3611_vm9, %v3648_v54, %v3539_v18 }
 0x2a0   :  { %3894 = vmatpush1.bf16.msra.mxu1 %v4890_v63  ;;  %v3591_v45 = vpop.permute.xlu0 %3590  ;;  %v3650_v28 = vsel %vm3613_vm10, %v3649_v15, %v3543_v44  ;;  %v3563_v42 = vpop.permute.xlu1 %3562  ;;  %v4897_v44 = vld [vmem:[%s6839_s2] sm:$0xff]  }
 0x2a1   :  { %3895 = vmatprep.subr.bf16.mxu1 %v4916_v6  ;;  %v3662_v20 = vsel %vm3607_vm7, %v3661_v59, %v3591_v45  ;;  %v3651_v61 = vsel %vm3615_vm11, %v3650_v28, %v3547_v4  ;;  %v7027_v4 = vld [vmem:[#allocation23_spill] sm:$0xff] }
 0x2a2   :  { %v3652_v52 = vsel %vm3617_vm12, %v3651_v61, %v6744_v0  ;;  %v3670_v48 = vsub.s32 5, %v7027_v4  ;;  %v3927_v27 = vsub.s32 0, %v7027_v4 }
 0x2a3   :  { %v3653_v60 = vsel %vm3619_vm13, %v3652_v52, %v3555_v56 }
 0x2a4   :  { %3896 = vmatpush1.bf16.msra.mxu1 %v4891_v12  ;;  %v3595_v23 = vpop.permute.xlu0 %3594  ;;  %v3654_v41 = vsel %vm3621_vm14, %v3653_v60, %v3559_v53  ;;  %v3567_v10 = vpop.permute.xlu1 %3566  ;;  %v3671_v21 = vrot.slane %v7029_v17, %v3670_v48  ;;  %v3928_v36 = vrot.slane %v83_v16, %v3927_v27 }
 0x2a5   :  { %v3663_v25 = vsel %vm3609_vm8, %v3662_v20, %v3595_v23  ;;  %3897 = vmatprep.subr.bf16.mxu1 %v4916_v6  ;;  %v3655_v34 = vsel %vm3623_vm15, %v3654_v41, %v3563_v42 }
 0x2a6   :  { %v3667_v29 = vpack.c.bf16 %v3663_v25, %v3663_v25  ;;  %v3656_v30 = vsel %vm3625_vm0, %v3655_v34, %v3567_v10 }
 0x2a7   :  { %v3666_v62 = vpack.c.bf16 %v3656_v30, %v3656_v30 }
 0x2a8   :  { %3898 = vmatpush1.bf16.msra.mxu1 %v4892_v14  ;;  %4244 = vmatprep.mubr.msk.bf16.mxu1 %vm3611_vm9, %v3667_v29 }
 0x2a9   :  { %3899 = vmatprep.subr.bf16.mxu1 %v4916_v6 }
 0x2ac   :  { %3900 = vmatpush1.bf16.msra.mxu1 %v4893_v2 }
 0x2ad   :  { %3901 = vmatprep.subr.bf16.mxu1 %v4916_v6 }
 0x2b0   :  { %3902 = vmatpush1.bf16.msra.mxu1 %v4894_v51 }
 0x2b1   :  { %3903 = vmatprep.subr.bf16.mxu1 %v4916_v6 }
 0x2b4   :  { %3904 = vmatpush1.bf16.msra.mxu1 %v4895_v38 }
 0x2b5   :  { %3905 = vmatprep.subr.bf16.mxu1 %v4916_v6 }
 0x2b8   :  { %3906 = vmatpush1.bf16.msra.mxu1 %v4896_v33 }
 0x2b9   :  { %4618 = vmatprep.subr.bf16.mxu1 %v4917_v32 }
 0x2bb   :  { %3916 = vmatmul.mubr.bf16.vlgmr.msra.gmra.mrb[100].mxu1 %v3666_v62 }
 0x2bc   :  { %4619 = vmatpush3.bf16.msra.mxu1 %v4897_v44  ;;  %4622 = vmatprep.mubr.msk.bf16.mxu1 %vm4918_vm1, %v4917_v32 }
 0x2bd   :  { %4620 = vmatprep.subr.bf16.mxu1 %v4917_v32 }
 0x2c0   :  { %4621 = vmatpush3.bf16.msra.mxu1 %v4898_v58 }
 0x35e   :  { %v4379_v6 = vpop.f32.mrb[96].mxu1 }
 0x35f   :  { %v4380_v47 = vpop.f32.mrb[97].mxu1 }
 0x360   :  { %v4381_v18 = vadd.f32 %v4380_v47, %v4379_v6  ;;  %v4382_v0 = vpop.f32.mrb[98].mxu1 }
 0x361   :  { %v4383_v9 = vpop.f32.mrb[99].mxu1 }
 0x362   :  { %v3878_v39 = vadd.f32 %v4381_v18, %v3671_v21 }
 0x38e   :  { %v3917_v5 = vpop.f32.mrb[100].mxu1 }
 0x38f   :  { %v3918_v49 = vadd.f32 %v3917_v5, %v3878_v39  ;;  %v3919_v8 = vpop.f32.mrb[101].mxu1 }
 0x390   :  { %v3920_v19 = vpop.f32.mrb[102].mxu1 }
 0x391   :  { %v3923_v40 = vmax.f32 %v3918_v49, 0.0  ;;  %v3921_v26 = vpop.f32.mrb[103].mxu1 }
 0x393   :  { %v3924_v31 = vpack.c.bf16 %v3923_v40, %v3923_v40 }
 0x395   :  { %4623 = vmatmul.mubr.msk.bf16.vlgmr.msra.gmra.mrb[104].mxu1 %vm3603_vm5, %v3924_v31 }
 0x468   :  { %v3978_v3 = vpop.f32.mrb[104].mxu1 }
 0x469   :  { %v3979_v57 = vadd.f32 %v3978_v3, %v3928_v36  ;;  %v4624_v22 = vpop.f32.mrb[105].mxu1 }
 0x46a   :  { %v3981_v46 = vpop.f32.mrb[106].mxu1 }
 0x46b   :  { %3984 = vst [vmem:[%s6840_s3] sm:$0xff] %v3979_v57  ;;  %v4625_v7 = vpop.f32.mrb[107].mxu1 }

</bundles_post_ra>
